<compile_context>
chip_gen: v7x
topology: tpu7x:2x2x1
jax: 0.10.0
libtpu: 0.0.40
codegen_flags: <defaults>
</compile_context>

<pallas_src>
import functools

import jax
import jax.numpy as jnp
from jax.experimental import pallas as pl
from jax.experimental.pallas import tpu as pltpu

# torchvision vgg16 "D" configuration ('M' = MaxPool2d(2, 2))
VGG16_CFG = [64, 64, 'M', 128, 128, 'M', 256, 256, 256, 'M',
             512, 512, 512, 'M', 512, 512, 512, 'M']


# -----------------------------------------------------------------------------
# Small helpers
# -----------------------------------------------------------------------------
def _round_up(x, m):
    return ((x + m - 1) // m) * m


def _pick_divisor(n, limit, need_even=False):
    """Largest divisor of n (even if required) that is <= limit."""
    cands = [d for d in range(1, n + 1)
             if n % d == 0 and (not need_even or d % 2 == 0)]
    good = [d for d in cands if d <= limit]
    return max(good) if good else min(cands)


@functools.lru_cache(maxsize=None)
def _vmem_limit_bytes():
    # 3/4 of physical VMEM, capped at 64 MiB: v5e/v6e -> 64 MiB, v7x -> 48 MiB.
    try:
        cap = int(pltpu.get_tpu_info().vmem_capacity_bytes)
    except Exception:
        return 48 * 1024 * 1024
    return int(min(cap * 3 // 4, 64 * 1024 * 1024))


def _compiler_params(n_axes):
    return pltpu.CompilerParams(
        dimension_semantics=("parallel",) * n_axes,
        vmem_limit_bytes=_vmem_limit_bytes())


# -----------------------------------------------------------------------------
# Pallas kernels
# -----------------------------------------------------------------------------
def _conv_fused_kernel(x_ref, w_ref, b_ref, *o_refs, th, rh, w_out,
                       do_relu, do_pool, emit):
    """Fused 3x3 conv (stride 1, pad 1) + bias [+ReLU] [+2x2 max-pool].

    Emits up to three stages (pre-ReLU / post-ReLU / post-pool) in one pass so
    requested intermediate layers never need standalone ReLU/MaxPool passes.

    x_ref : (1, H+2, W+2, Cin)  zero-padded NHWC bf16 image (whole image resident).
    w_ref : (9, Cin, tc)        bf16 taps, kh*3+kw major.
    b_ref : (1, tc)             f32 bias.
    o_refs: one ref per emitted stage, (1, th, W, tc) or (1, th//2, W//2, tc).
    """
    hi = pl.program_id(2)
    row0 = hi * th
    cin = x_ref.shape[3]
    tc = w_ref.shape[2]
    bias = b_ref[...]                                    # (1, tc) f32

    for r in range(0, th, rh):                           # static row-chunk loop
        # rh+2 input rows cover this chunk's 1-row halo; single VMEM read.
        rows = x_ref[0, pl.ds(row0 + r, rh + 2), :, :]   # (rh+2, W+2, Cin) bf16
        acc = None
        for kw in range(3):
            cols = rows[:, kw:kw + w_out, :]             # one column shift per kw
            for kh in range(3):
                lhs = cols[kh:kh + rh].reshape(rh * w_out, cin)
                t = jnp.dot(lhs, w_ref[3 * kh + kw],
                            preferred_element_type=jnp.float32)
                acc = t if acc is None else acc + t      # value-resident f32 acc
        y = acc.reshape(rh, w_out, tc) + bias            # f32 epilogue

        oi = 0
        if 'conv' in emit:
            o_refs[oi][0, r:r + rh, :, :] = y.astype(o_refs[oi].dtype)
            oi += 1
        if do_relu:
            y = jnp.maximum(y, 0.0)
            if 'relu' in emit:
                o_refs[oi][0, r:r + rh, :, :] = y.astype(o_refs[oi].dtype)
                oi += 1
        if do_pool:
            # 2x2/stride-2 max pool on VALUES (bias/ReLU commute with max, and
            # max commutes with the monotone bf16 cast -> matches torch order).
            yh = jnp.maximum(y[0::2], y[1::2])
            yp = jnp.maximum(yh[:, 0::2, :], yh[:, 1::2, :])
            o_refs[oi][0, r // 2:(r + rh) // 2, :, :] = yp.astype(o_refs[oi].dtype)
            oi += 1


def _relu_kernel(x_ref, o_ref):
    # Fallback only (fused path normally covers every ReLU).
    o_ref[...] = jnp.maximum(x_ref[...], jnp.zeros((), x_ref.dtype))


def _maxpool_kernel(x_ref, o_ref):
    # Fallback only: 2x2/stride-2 max pool done entirely on values, no scratch.
    x = x_ref[0]                                          # (2*tho, W, C)
    xh = jnp.maximum(x[0::2], x[1::2])
    xp = jnp.maximum(xh[:, 0::2, :], xh[:, 1::2, :])
    o_ref[...] = xp[None].astype(o_ref.dtype)


# -----------------------------------------------------------------------------
# Pallas wrappers
# -----------------------------------------------------------------------------
def conv3x3_fused(x, w, b, *, do_relu, do_pool, emit):
    """3x3 conv, stride 1, pad 1, fused with bias [+ReLU] [+2x2 pool].

    Returns one array per stage listed in `emit` (subset of conv/relu/pool, in
    that order); the last one is the running activation for the next layer.
    """
    n, h, wd, cin = x.shape
    cout = w.shape[-1]
    if do_pool:
        # TODO(synk): torch floor-pools odd dims; VGG spatial dims are even here.
        assert h % 2 == 0 and wd % 2 == 0

    cin_p = max(8, _round_up(cin, 8))
    if cin_p != cin:                       # zero channels contribute nothing
        x = jnp.pad(x, ((0, 0), (0, 0), (0, 0), (0, cin_p - cin)))
        w = jnp.pad(w, ((0, 0), (0, 0), (0, cin_p - cin), (0, 0)))
    # Single zero-pad (+1 halo all around); the padded image is one resident
    # VMEM block so the activation is read from HBM exactly once per image.
    # TODO(synk): for very large spatial inputs (>~300x300 at 64ch) the resident
    # image block would exceed the VMEM budget; an H-halo DMA tiling would be
    # needed there.  VGG-sized inputs fit comfortably.
    xp = jnp.pad(x, ((0, 0), (1, 1), (1, 1), (0, 0))).astype(jnp.bfloat16)
    w9 = w.reshape(9, cin_p, cout).astype(jnp.bfloat16)
    b2 = b.reshape(1, cout).astype(jnp.float32)

    # Cout tiling: extra parallel programs for the 512-ch layers (both v7x TCs
    # busy) and bounds the weight block to <=2.4 MiB.
    tc = min(cout, 256)
    n_ci = cout // tc

    # Tile heights from byte budgets:
    #   th : output tile rows, ~2 MiB bf16 per emitted stage (double-buffered).
    #   rh : rows per in-kernel accumulation chunk, ~512 KiB of f32 accumulator
    #        kept in values -> one output store per chunk, no acc VMEM ping-pong.
    th = _pick_divisor(h, max(1, (2 * 1024 * 1024) // (wd * tc * 2)),
                       need_even=do_pool)
    rh = _pick_divisor(th, max(1, (512 * 1024) // (wd * tc * 4)),
                       need_even=do_pool)
    n_hi = h // th

    in_specs = [
        pl.BlockSpec((1, h + 2, wd + 2, cin_p), lambda ni, ci, hi: (ni, 0, 0, 0)),
        pl.BlockSpec((9, cin_p, tc), lambda ni, ci, hi: (0, 0, ci)),
        pl.BlockSpec((1, tc), lambda ni, ci, hi: (0, ci)),
    ]
    out_shapes, out_specs = [], []
    for stage in emit:
        if stage == 'pool':
            out_shapes.append(
                jax.ShapeDtypeStruct((n, h // 2, wd // 2, cout), jnp.bfloat16))
            out_specs.append(pl.BlockSpec((1, th // 2, wd // 2, tc),
                                          lambda ni, ci, hi: (ni, hi, 0, ci)))
        else:
            out_shapes.append(jax.ShapeDtypeStruct((n, h, wd, cout), jnp.bfloat16))
            out_specs.append(pl.BlockSpec((1, th, wd, tc),
                                          lambda ni, ci, hi: (ni, hi, 0, ci)))

    kernel = functools.partial(_conv_fused_kernel, th=th, rh=rh, w_out=wd,
                               do_relu=do_relu, do_pool=do_pool, emit=tuple(emit))
    outs = pl.pallas_call(
        kernel,
        out_shape=tuple(out_shapes),
        grid=(n, n_ci, n_hi),
        in_specs=in_specs,
        out_specs=tuple(out_specs),
        compiler_params=_compiler_params(3),
    )(xp, w9, b2)
    if not isinstance(outs, (tuple, list)):
        outs = (outs,)
    return list(outs)


def relu(x):
    """Standalone ReLU (fallback; the fused conv path normally absorbs it)."""
    n, h, wd, c = x.shape
    th = _pick_divisor(h, max(1, (4 * 1024 * 1024) // (wd * c * 2)))
    spec = pl.BlockSpec((1, th, wd, c), lambda i, j: (i, j, 0, 0))
    return pl.pallas_call(
        _relu_kernel,
        out_shape=jax.ShapeDtypeStruct(x.shape, x.dtype),
        grid=(n, h // th),
        in_specs=[spec],
        out_specs=spec,
        compiler_params=_compiler_params(2),
    )(x)


def maxpool2x2(x):
    """Standalone 2x2/stride-2 max pool (fallback; normally fused into conv)."""
    n, h, wd, c = x.shape
    # TODO(synk): torch floor-pools odd dims; VGG spatial dims are always even here.
    assert h % 2 == 0 and wd % 2 == 0
    ho, wo = h // 2, wd // 2
    tho = _pick_divisor(ho, max(1, (2 * 1024 * 1024) // (wd * c * 2)))
    return pl.pallas_call(
        _maxpool_kernel,
        out_shape=jax.ShapeDtypeStruct((n, ho, wo, c), x.dtype),
        grid=(n, ho // tho),
        in_specs=[pl.BlockSpec((1, 2 * tho, wd, c), lambda i, j: (i, j, 0, 0))],
        out_specs=pl.BlockSpec((1, tho, wo, c), lambda i, j: (i, j, 0, 0)),
        compiler_params=_compiler_params(2),
    )(x)


# -----------------------------------------------------------------------------
# Model construction (synthetic deterministic weights) and forward pass
# -----------------------------------------------------------------------------
def build_vgg16_feature_layers(key, num_layers):
    """First `num_layers` layers of vgg16.features with synthetic weights.
    Each entry: ('conv', (w_hwio_bf16, b_f32)) / ('relu', None) / ('pool', None).
    # TODO(synk): models.vgg16(pretrained=True) loads ImageNet weights from a
    # checkpoint; no checkpoint here, weights are deterministic synthetic tensors.
    """
    descr = []
    in_c = 3
    for v in VGG16_CFG:
        if v == 'M':
            descr.append(('pool', None))
        else:
            descr.append(('conv', (in_c, v)))
            descr.append(('relu', None))
            in_c = v
    layers = []
    for kind, meta in descr[:num_layers]:
        if kind == 'conv':
            cin, cout = meta
            key, kw, kb = jax.random.split(key, 3)
            w = (jax.random.normal(kw, (3, 3, cin, cout), jnp.float32) * 0.05
                 ).astype(jnp.bfloat16)
            b = jax.random.normal(kb, (cout,), jnp.float32) * 0.05
            layers.append(('conv', (w, b)))
        else:
            layers.append((kind, None))
    return layers


def _to_nchw_f32(x_nhwc):
    return jnp.transpose(x_nhwc, (0, 3, 1, 2)).astype(jnp.float32)


def net_vgg_features_forward(img_nchw, layers, layer_ids):
    """Analogue of NetVGGFeatures.forward: NCHW f32 in, list of NCHW f32 out."""
    if img_nchw.shape[1] == 1:
        x = jnp.repeat(img_nchw, 3, axis=1)       # torch.repeat_interleave(t, 3, 1)
    else:
        x = img_nchw
    x = jnp.transpose(x, (0, 2, 3, 1)).astype(jnp.bfloat16)   # NHWC bf16
    last = layer_ids[-1]
    ids = set(layer_ids)
    out_by_id = {}
    i = 0
    while i <= last:
        kind, params = layers[i]
        if kind == 'conv':
            w, b = params
            do_relu = i + 1 <= last and layers[i + 1][0] == 'relu'
            do_pool = do_relu and i + 2 <= last and layers[i + 2][0] == 'pool'
            emit = []
            if i in ids:
                emit.append('conv')
            if do_relu and do_pool and (i + 1) in ids:
                emit.append('relu')
            final = 'pool' if do_pool else ('relu' if do_relu else 'conv')
            if final not in emit:
                emit.append(final)
            outs = conv3x3_fused(x, w, b, do_relu=do_relu, do_pool=do_pool,
                                 emit=tuple(emit))
            stage_layer = {'conv': i, 'relu': i + 1, 'pool': i + 2}
            for stage, arr in zip(emit, outs):
                li = stage_layer[stage]
                if li in ids:
                    out_by_id[li] = _to_nchw_f32(arr)
            x = outs[-1]
            i += 1 + int(do_relu) + int(do_pool)
        elif kind == 'relu':          # fallback (not reached for VGG ordering)
            x = relu(x)
            if i in ids:
                out_by_id[i] = _to_nchw_f32(x)
            i += 1
        else:                         # 'pool' fallback (not reached for VGG ordering)
            x = maxpool2x2(x)
            if i in ids:
                out_by_id[i] = _to_nchw_f32(x)
            i += 1
    return [out_by_id[j] for j in sorted(set(layer_ids)) if j <= last]


# -----------------------------------------------------------------------------
# Pure-JAX reference (same bf16-activation / f32-accumulation math)
# -----------------------------------------------------------------------------
def _ref_forward(img_nchw, layers, layer_ids):
    x = jnp.repeat(img_nchw, 3, axis=1) if img_nchw.shape[1] == 1 else img_nchw
    x = x.astype(jnp.bfloat16)
    outputs = []
    for i in range(layer_ids[-1] + 1):
        kind, params = layers[i]
        if kind == 'conv':
            w, b = params
            y = jax.lax.conv_general_dilated(
                x, w, window_strides=(1, 1), padding=((1, 1), (1, 1)),
                dimension_numbers=('NCHW', 'HWIO', 'NCHW'),
                preferred_element_type=jnp.float32)
            x = (y + b[None, :, None, None]).astype(jnp.bfloat16)
        elif kind == 'relu':
            x = jnp.maximum(x, jnp.zeros((), x.dtype))
        else:
            x = jax.lax.reduce_window(
                x, jnp.array(-jnp.inf, x.dtype), jax.lax.max,
                (1, 1, 2, 2), (1, 1, 2, 2), 'VALID')
        if i in layer_ids:
            outputs.append(x.astype(jnp.float32))
    return outputs


# -----------------------------------------------------------------------------
if __name__ == "__main__":
    key = jax.random.PRNGKey(0)
    k_img, k_par = jax.random.split(key)

    # VGG16 prefix through features[9]:
    #   conv+relu | conv | relu | pool | conv+relu | conv+relu+pool
    # layer_ids hit a raw conv output (2), a pool output (4) and a fused
    # conv+relu+pool output (9) -> exercises single- and multi-output fusion.
    layer_ids = [2, 4, 9]
    img = jax.random.normal(k_img, (2, 3, 16, 16), jnp.float32)   # NCHW like torch

    layers = build_vgg16_feature_layers(k_par, layer_ids[-1] + 1)

    outs = net_vgg_features_forward(img, layers, layer_ids)
    outs = [jax.block_until_ready(o) for o in outs]

    refs = _ref_forward(img, layers, layer_ids)
    assert len(outs) == len(refs)
    for o, r in zip(outs, refs):
        assert o.shape == r.shape and o.dtype == r.dtype
        err = float(jnp.max(jnp.abs(o - r)))
        assert jnp.allclose(o, r, atol=5e-2, rtol=5e-2), err

    print("KERNEL_OK")
</pallas_src>

<mosaic_0001>
module attributes {stable_mosaic.version = 11 : i64} {
  func.func @_conv_fused_kernel(%arg0: i32, %arg1: i32, %arg2: i32, %arg3: memref<1x18x18x8xbf16, #tpu.memory_space<vmem>>, %arg4: memref<9x8x64xbf16, #tpu.memory_space<vmem>>, %arg5: memref<1x64xf32, #tpu.memory_space<vmem>>, %arg6: memref<1x16x16x64xbf16, #tpu.memory_space<vmem>>) attributes {dimension_semantics = [#tpu.dimension_semantics<parallel>, #tpu.dimension_semantics<parallel>, #tpu.dimension_semantics<parallel>], iteration_bounds = array<i64: 2, 1, 1>, scalar_prefetch = 0 : i64, scratch_operands = 0 : i64, tpu.core_type = #tpu.core_type<tc>, window_params = [{transform_indices = @transform_0, window_bounds = array<i64: 1, 18, 18, 8>}, {transform_indices = @transform_1, window_bounds = array<i64: 9, 8, 64>}, {transform_indices = @transform_2, window_bounds = array<i64: 1, 64>}, {transform_indices = @transform_3, window_bounds = array<i64: 1, 16, 16, 64>}]} {
    %c16_i32 = arith.constant 16 : i32
    %0 = arith.muli %arg2, %c16_i32 : i32
    %c0 = arith.constant 0 : index
    %c0_0 = arith.constant 0 : index
    %1 = vector.load %arg5[%c0, %c0_0] : memref<1x64xf32, #tpu.memory_space<vmem>>, vector<1x64xf32>
    %c0_i32 = arith.constant 0 : i32
    %2 = arith.addi %0, %c0_i32 : i32
    %c0_1 = arith.constant 0 : index
    %3 = arith.index_cast %2 : i32 to index
    %c0_2 = arith.constant 0 : index
    %c0_3 = arith.constant 0 : index
    %4 = vector.load %arg3[%c0_1, %3, %c0_2, %c0_3] : memref<1x18x18x8xbf16, #tpu.memory_space<vmem>>, vector<1x18x18x8xbf16>
    %5 = vector.shape_cast %4 : vector<1x18x18x8xbf16> to vector<18x18x8xbf16>
    %6 = vector.extract_strided_slice %5 {offsets = [0, 0, 0], sizes = [18, 16, 8], strides = [1, 1, 1]} : vector<18x18x8xbf16> to vector<18x16x8xbf16>
    %7 = vector.extract_strided_slice %6 {offsets = [0, 0, 0], sizes = [16, 16, 8], strides = [1, 1, 1]} : vector<18x16x8xbf16> to vector<16x16x8xbf16>
    %8 = vector.shape_cast %7 : vector<16x16x8xbf16> to vector<256x8xbf16>
    %c0_4 = arith.constant 0 : index
    %c0_5 = arith.constant 0 : index
    %c0_6 = arith.constant 0 : index
    %9 = vector.load %arg4[%c0_4, %c0_5, %c0_6] : memref<9x8x64xbf16, #tpu.memory_space<vmem>>, vector<1x8x64xbf16>
    %10 = vector.shape_cast %9 : vector<1x8x64xbf16> to vector<8x64xbf16>
    %cst = arith.constant dense<0.000000e+00> : vector<256x64xf32>
    %11 = tpu.matmul %8, %10, %cst {dimension_numbers = #tpu.dot_dimension_numbers<[1], [0], [0], [1], [0, 0, 1, 1], [], []>} : vector<256x8xbf16>, vector<8x64xbf16>, vector<256x64xf32> -> vector<256x64xf32>
    %12 = vector.extract_strided_slice %6 {offsets = [1, 0, 0], sizes = [16, 16, 8], strides = [1, 1, 1]} : vector<18x16x8xbf16> to vector<16x16x8xbf16>
    %13 = vector.shape_cast %12 : vector<16x16x8xbf16> to vector<256x8xbf16>
    %c3 = arith.constant 3 : index
    %c0_7 = arith.constant 0 : index
    %c0_8 = arith.constant 0 : index
    %14 = vector.load %arg4[%c3, %c0_7, %c0_8] : memref<9x8x64xbf16, #tpu.memory_space<vmem>>, vector<1x8x64xbf16>
    %15 = vector.shape_cast %14 : vector<1x8x64xbf16> to vector<8x64xbf16>
    %cst_9 = arith.constant dense<0.000000e+00> : vector<256x64xf32>
    %16 = tpu.matmul %13, %15, %cst_9 {dimension_numbers = #tpu.dot_dimension_numbers<[1], [0], [0], [1], [0, 0, 1, 1], [], []>} : vector<256x8xbf16>, vector<8x64xbf16>, vector<256x64xf32> -> vector<256x64xf32>
    %17 = arith.addf %11, %16 : vector<256x64xf32>
    %18 = vector.extract_strided_slice %6 {offsets = [2, 0, 0], sizes = [16, 16, 8], strides = [1, 1, 1]} : vector<18x16x8xbf16> to vector<16x16x8xbf16>
    %19 = vector.shape_cast %18 : vector<16x16x8xbf16> to vector<256x8xbf16>
    %c6 = arith.constant 6 : index
    %c0_10 = arith.constant 0 : index
    %c0_11 = arith.constant 0 : index
    %20 = vector.load %arg4[%c6, %c0_10, %c0_11] : memref<9x8x64xbf16, #tpu.memory_space<vmem>>, vector<1x8x64xbf16>
    %21 = vector.shape_cast %20 : vector<1x8x64xbf16> to vector<8x64xbf16>
    %cst_12 = arith.constant dense<0.000000e+00> : vector<256x64xf32>
    %22 = tpu.matmul %19, %21, %cst_12 {dimension_numbers = #tpu.dot_dimension_numbers<[1], [0], [0], [1], [0, 0, 1, 1], [], []>} : vector<256x8xbf16>, vector<8x64xbf16>, vector<256x64xf32> -> vector<256x64xf32>
    %23 = arith.addf %17, %22 : vector<256x64xf32>
    %24 = vector.extract_strided_slice %5 {offsets = [0, 1, 0], sizes = [18, 16, 8], strides = [1, 1, 1]} : vector<18x18x8xbf16> to vector<18x16x8xbf16>
    %25 = vector.extract_strided_slice %24 {offsets = [0, 0, 0], sizes = [16, 16, 8], strides = [1, 1, 1]} : vector<18x16x8xbf16> to vector<16x16x8xbf16>
    %26 = vector.shape_cast %25 : vector<16x16x8xbf16> to vector<256x8xbf16>
    %c1 = arith.constant 1 : index
    %c0_13 = arith.constant 0 : index
    %c0_14 = arith.constant 0 : index
    %27 = vector.load %arg4[%c1, %c0_13, %c0_14] : memref<9x8x64xbf16, #tpu.memory_space<vmem>>, vector<1x8x64xbf16>
    %28 = vector.shape_cast %27 : vector<1x8x64xbf16> to vector<8x64xbf16>
    %cst_15 = arith.constant dense<0.000000e+00> : vector<256x64xf32>
    %29 = tpu.matmul %26, %28, %cst_15 {dimension_numbers = #tpu.dot_dimension_numbers<[1], [0], [0], [1], [0, 0, 1, 1], [], []>} : vector<256x8xbf16>, vector<8x64xbf16>, vector<256x64xf32> -> vector<256x64xf32>
    %30 = arith.addf %23, %29 : vector<256x64xf32>
    %31 = vector.extract_strided_slice %24 {offsets = [1, 0, 0], sizes = [16, 16, 8], strides = [1, 1, 1]} : vector<18x16x8xbf16> to vector<16x16x8xbf16>
    %32 = vector.shape_cast %31 : vector<16x16x8xbf16> to vector<256x8xbf16>
    %c4 = arith.constant 4 : index
    %c0_16 = arith.constant 0 : index
    %c0_17 = arith.constant 0 : index
    %33 = vector.load %arg4[%c4, %c0_16, %c0_17] : memref<9x8x64xbf16, #tpu.memory_space<vmem>>, vector<1x8x64xbf16>
    %34 = vector.shape_cast %33 : vector<1x8x64xbf16> to vector<8x64xbf16>
    %cst_18 = arith.constant dense<0.000000e+00> : vector<256x64xf32>
    %35 = tpu.matmul %32, %34, %cst_18 {dimension_numbers = #tpu.dot_dimension_numbers<[1], [0], [0], [1], [0, 0, 1, 1], [], []>} : vector<256x8xbf16>, vector<8x64xbf16>, vector<256x64xf32> -> vector<256x64xf32>
    %36 = arith.addf %30, %35 : vector<256x64xf32>
    %37 = vector.extract_strided_slice %24 {offsets = [2, 0, 0], sizes = [16, 16, 8], strides = [1, 1, 1]} : vector<18x16x8xbf16> to vector<16x16x8xbf16>
    %38 = vector.shape_cast %37 : vector<16x16x8xbf16> to vector<256x8xbf16>
    %c7 = arith.constant 7 : index
    %c0_19 = arith.constant 0 : index
    %c0_20 = arith.constant 0 : index
    %39 = vector.load %arg4[%c7, %c0_19, %c0_20] : memref<9x8x64xbf16, #tpu.memory_space<vmem>>, vector<1x8x64xbf16>
    %40 = vector.shape_cast %39 : vector<1x8x64xbf16> to vector<8x64xbf16>
    %cst_21 = arith.constant dense<0.000000e+00> : vector<256x64xf32>
    %41 = tpu.matmul %38, %40, %cst_21 {dimension_numbers = #tpu.dot_dimension_numbers<[1], [0], [0], [1], [0, 0, 1, 1], [], []>} : vector<256x8xbf16>, vector<8x64xbf16>, vector<256x64xf32> -> vector<256x64xf32>
    %42 = arith.addf %36, %41 : vector<256x64xf32>
    %43 = vector.extract_strided_slice %5 {offsets = [0, 2, 0], sizes = [18, 16, 8], strides = [1, 1, 1]} : vector<18x18x8xbf16> to vector<18x16x8xbf16>
    %44 = vector.extract_strided_slice %43 {offsets = [0, 0, 0], sizes = [16, 16, 8], strides = [1, 1, 1]} : vector<18x16x8xbf16> to vector<16x16x8xbf16>
    %45 = vector.shape_cast %44 : vector<16x16x8xbf16> to vector<256x8xbf16>
    %c2 = arith.constant 2 : index
    %c0_22 = arith.constant 0 : index
    %c0_23 = arith.constant 0 : index
    %46 = vector.load %arg4[%c2, %c0_22, %c0_23] : memref<9x8x64xbf16, #tpu.memory_space<vmem>>, vector<1x8x64xbf16>
    %47 = vector.shape_cast %46 : vector<1x8x64xbf16> to vector<8x64xbf16>
    %cst_24 = arith.constant dense<0.000000e+00> : vector<256x64xf32>
    %48 = tpu.matmul %45, %47, %cst_24 {dimension_numbers = #tpu.dot_dimension_numbers<[1], [0], [0], [1], [0, 0, 1, 1], [], []>} : vector<256x8xbf16>, vector<8x64xbf16>, vector<256x64xf32> -> vector<256x64xf32>
    %49 = arith.addf %42, %48 : vector<256x64xf32>
    %50 = vector.extract_strided_slice %43 {offsets = [1, 0, 0], sizes = [16, 16, 8], strides = [1, 1, 1]} : vector<18x16x8xbf16> to vector<16x16x8xbf16>
    %51 = vector.shape_cast %50 : vector<16x16x8xbf16> to vector<256x8xbf16>
    %c5 = arith.constant 5 : index
    %c0_25 = arith.constant 0 : index
    %c0_26 = arith.constant 0 : index
    %52 = vector.load %arg4[%c5, %c0_25, %c0_26] : memref<9x8x64xbf16, #tpu.memory_space<vmem>>, vector<1x8x64xbf16>
    %53 = vector.shape_cast %52 : vector<1x8x64xbf16> to vector<8x64xbf16>
    %cst_27 = arith.constant dense<0.000000e+00> : vector<256x64xf32>
    %54 = tpu.matmul %51, %53, %cst_27 {dimension_numbers = #tpu.dot_dimension_numbers<[1], [0], [0], [1], [0, 0, 1, 1], [], []>} : vector<256x8xbf16>, vector<8x64xbf16>, vector<256x64xf32> -> vector<256x64xf32>
    %55 = arith.addf %49, %54 : vector<256x64xf32>
    %56 = vector.extract_strided_slice %43 {offsets = [2, 0, 0], sizes = [16, 16, 8], strides = [1, 1, 1]} : vector<18x16x8xbf16> to vector<16x16x8xbf16>
    %57 = vector.shape_cast %56 : vector<16x16x8xbf16> to vector<256x8xbf16>
    %c8 = arith.constant 8 : index
    %c0_28 = arith.constant 0 : index
    %c0_29 = arith.constant 0 : index
    %58 = vector.load %arg4[%c8, %c0_28, %c0_29] : memref<9x8x64xbf16, #tpu.memory_space<vmem>>, vector<1x8x64xbf16>
    %59 = vector.shape_cast %58 : vector<1x8x64xbf16> to vector<8x64xbf16>
    %cst_30 = arith.constant dense<0.000000e+00> : vector<256x64xf32>
    %60 = tpu.matmul %57, %59, %cst_30 {dimension_numbers = #tpu.dot_dimension_numbers<[1], [0], [0], [1], [0, 0, 1, 1], [], []>} : vector<256x8xbf16>, vector<8x64xbf16>, vector<256x64xf32> -> vector<256x64xf32>
    %61 = arith.addf %55, %60 : vector<256x64xf32>
    %62 = vector.shape_cast %61 : vector<256x64xf32> to vector<16x16x64xf32>
    %63 = vector.shape_cast %1 : vector<1x64xf32> to vector<1x1x64xf32>
    %64 = vector.broadcast %63 : vector<1x1x64xf32> to vector<16x16x64xf32>
    %65 = arith.addf %62, %64 : vector<16x16x64xf32>
    %cst_31 = arith.constant 0.000000e+00 : f32
    %66 = vector.broadcast %cst_31 : f32 to vector<16x16x64xf32>
    %67 = arith.maximumf %65, %66 : vector<16x16x64xf32>
    %68 = arith.truncf %67 : vector<16x16x64xf32> to vector<16x16x64xbf16>
    %c0_32 = arith.constant 0 : index
    %c0_33 = arith.constant 0 : index
    %c0_34 = arith.constant 0 : index
    %c0_35 = arith.constant 0 : index
    %69 = vector.load %arg6[%c0_32, %c0_33, %c0_34, %c0_35] : memref<1x16x16x64xbf16, #tpu.memory_space<vmem>>, vector<1x16x16x64xbf16>
    %70 = vector.shape_cast %69 : vector<1x16x16x64xbf16> to vector<16x16x64xbf16>
    %71 = vector.shape_cast %68 : vector<16x16x64xbf16> to vector<1x16x16x64xbf16>
    tpu.vector_store %arg6[%c0_32, %c0_33, %c0_34, %c0_35], %71 {strides = array<i32>} : memref<1x16x16x64xbf16, #tpu.memory_space<vmem>>, vector<1x16x16x64xbf16>,
    return
  }
  func.func @transform_0(%arg0: i32, %arg1: i32, %arg2: i32) -> (i32, i32, i32, i32) {
    %c0_i32 = arith.constant 0 : i32
    %c0_i32_0 = arith.constant 0 : i32
    %c0_i32_1 = arith.constant 0 : i32
    %c0_i32_2 = arith.constant 0 : i32
    return %arg0, %c0_i32, %c0_i32_0, %c0_i32_1 : i32, i32, i32, i32
  }
  func.func @transform_1(%arg0: i32, %arg1: i32, %arg2: i32) -> (i32, i32, i32) {
    %c0_i32 = arith.constant 0 : i32
    %c0_i32_0 = arith.constant 0 : i32
    %c0_i32_1 = arith.constant 0 : i32
    return %c0_i32, %c0_i32_0, %arg1 : i32, i32, i32
  }
  func.func @transform_2(%arg0: i32, %arg1: i32, %arg2: i32) -> (i32, i32) {
    %c0_i32 = arith.constant 0 : i32
    %c0_i32_0 = arith.constant 0 : i32
    return %c0_i32, %arg1 : i32, i32
  }
  func.func @transform_3(%arg0: i32, %arg1: i32, %arg2: i32) -> (i32, i32, i32, i32) {
    %c0_i32 = arith.constant 0 : i32
    %c0_i32_0 = arith.constant 0 : i32
    return %arg0, %arg2, %c0_i32, %arg1 : i32, i32, i32, i32
  }
}

</mosaic_0001>

<bundles_post_ra>
// kernel: tpu_custom_call.1
= control target key start
LH: loop header
LB: loop body
LE: loop exit
PB: predicated region body
PF: predicated region fallthrough
CT: control target
= control target key end

     0   :  { %8 = vsyncpa [#allocation3], 0  ;;  %s5797_s0 = inlined_call_operand.vmem [shape: bf16[2,18,18,8], index: 0, kind: input, shape index: {}]   ;;  %s5798_s1 = inlined_call_operand.vmem [shape: bf16[9,8,64], index: 1, kind: input, shape index: {}]   ;;  %s5799_s2 = inlined_call_operand.vmem [shape: f32[1,64], index: 2, kind: input, shape index: {}]   ;;  %s5800_s3 = inlined_call_operand.hbm [shape: bf16[2,16,16,64], index: 3, kind: output, shape index: {}]  }
   0x1   :  { %10 = vsyncpa [#allocation3 + $0x1], 0  ;;  %s4512_s12 = smov 0   ;;  %s4514_s13 = smov 0  }
   0x2   :  { %s4516_s14 = smov 0   ;;  %s4518_s15 = smov 0  }
   0x3   :  { %s4520_s16 = smov 0   ;;  %s4522_s17 = smov 0  }
   0x4 LB: > { %s3300_s18 = sadd.s32 4294967295, %s4487_s17   ;;  %s3301_s19 = sadd.s32 4294967294, %s4487_s17   ;;  %s4487_s17 = sphi %s4522_s17, %s16_s17   ;;  %s4483_s16 = sphi %s4520_s16, %s5978_s16   ;;  %s4479_s15 = sphi %s4518_s15, %s5977_s15   ;;  %s4475_s14 = sphi %s4516_s14, %s5976_s14   ;;  %s4471_s13 = sphi %s4514_s13, %s5975_s13   ;;  %s4467_s12 = sphi %s4512_s12, %s5974_s12  }
   0x5   : > { %s35_s20 = sadd.s32 1, %s4483_s16  ;;  %s124_s21 = sadd.s32 1, %s4475_s14 }
   0x6   : > { %p37_p0 = scmp.ge.s32.totalorder %s35_s20, 2  ;;  %p134_p1 = scmp.ne.s32.totalorder %s4475_s14, %s4471_s13 }
   0x7   : > { %p135_p2 = scmp.eq.s32.totalorder %s3300_s18, 1  ;;  %p140_p3 = scmp.ne.s32.totalorder %s4471_s13, %s4467_s12 }
   0x8   : > { %s5980_s20 = smov (%p37_p0, %s35_s20), 0  ;;  %p141_p5 = scmp.eq.s32.totalorder %s3301_s19, 1 }
   0x9   : > { %p4552_p4 = por %p135_p2, %p134_p1  ;;  %s117_s23 = ssub.s32 %s4483_s16, %s5980_s20 }
   0xa   : > { %p3306_p6 = scmp.ge.s32.totalorder %s4487_s17, 1  ;;  %p122_p7 = scmp.eq.s32.totalorder %s117_s23, 0 }
   0xb   : > { %p4559_p8 = por %p141_p5, %p140_p3  ;;  %p180_p9 = scmp.lt.s32.totalorder %s4487_s17, 3 }
   0xc   : > { %s4565_s25 = scalar_select %p122_p7, %s4475_s14, %s124_s21  }
   0xd   : > { %p181_p10 = pnand %p3306_p6, %p180_p9 }
   0xf   : > { %184 = sbr.rel (%p181_p10) target bundleno = 569 (0x239), region = 32 }
  0x16   : > { %v3309_v0 = vld [vmem:[%s5798_s1 + $0xc] sm:$0xf]  ;;  %vm416_vm0 = vcmask 1043456   ;;  %p211_p11 = scmp.lt.s32.totalorder %s4479_s15, 1  ;;  %v3410_v2 = vld [vmem:[%s5798_s1 + $0x10] sm:$0xf] }
  0x17   : > { %4321 = vmatprep.subr.msk.bf16.mxu1 %vm416_vm0, %v3309_v0  ;;  %v418_v1 = vsel %vm416_vm0, %v3309_v0, 0  ;;  %v284_v3 = vld [vmem:[%s5798_s1] sm:$0xf]  ;;  %4325 = vmatprep.subr.msk.bf16.mxu0 %vm416_vm0, %v3410_v2  ;;  %v4582_v4 = vsel %vm416_vm0, %v3410_v2, 0  ;;  %v3428_v5 = vld [vmem:[%s5798_s1 + $0x1c] sm:$0xf] }
  0x18   : > { %3758 = vmatpush3.bf16.msra.mxu1 %v418_v1  ;;  %s212_s5 = scalar_select %p211_p11, %s4479_s15, 1  ;;  %5866 = vst [vmem:[#allocation5_spill] sm:$0xff] %v4582_v4  ;;  %3894 = vmatpush3.bf16.msra.mxu0 %v4582_v4  ;;  %vm2112_vm1 = vcmask 1042432   ;;  %vm2113_vm2 = vcmask 1046532   ;;  %vm367_vm3 = vcmask 64512   ;;  %v590_v6 = vsel %vm416_vm0, %v284_v3, 0 }
  0x19   : > { %4322 = vmatprep.subr.msk.bf16.mxu1 %vm416_vm0, %v284_v3  ;;  %4327 = vmatprep.subr.msk.bf16.mxu0 %vm416_vm0, %v3428_v5  ;;  %vm959_vm4 = vsmask.f32 3328  ;;  %vm960_vm5 = vsmask.f32 7440  ;;  %vm4603_vm6 = vmor %vm2112_vm1, %vm2113_vm2  ;;  %v4611_v15 = vsel %vm416_vm0, %v3428_v5, 0  ;;  %s208_s7 = sand.u32 1, %s4471_s13  }
  0x1a   : > { %s4331_s8 = smul.u32 216, %s212_s5  ;;  %v4630_v24 = vld [vmem:[%s5798_s1 + $0x18] sm:$0xf]  ;;  %vm4671_vm7 = vmor %vm959_vm4, %vm960_vm5  ;;  %s3307_s10 = sshll.u32 %s208_s7, 7  ;;  %vm3143_vm8 = vcmask 519168  }
  0x1b   : > { %s3603_s18 = sshll.u32 %s4479_s15, 11  ;;  %s5751_s15 = scalar_lea.sflag [#allocation3], %s208_s7 }
  0x1c   : > { %s4593_s11 = scalar_lea.vmem %s5797_s0, %s4331_s8  ;;  %s5739_s26 = scalar_lea.hbm %s5800_s3, %s3603_s18 }
  0x1d   : > { %v233_v7 = vld [vmem:[%s4593_s11 + $0xc] sm:$0xf]  ;;  %v234_v8 = vld [vmem:[%s4593_s11 + $0x10] sm:$0xf]  ;;  %v4599_v9 = vld [vmem:[%s4593_s11 + $0x18] sm:$0xf] }
  0x1e   : > { %v4601_v10 = vcombine.low %v233_v7, %v234_v8  ;;  %v987_v11 = vshrl.u32 %v233_v7, 16  ;;  %v990_v12 = vshll.u32 %v233_v7, 16  ;;  %v4608_v14 = vld [vmem:[%s4593_s11 + $0x1c] sm:$0xf]  ;;  %v1000_v16 = vshrl.u32 %v234_v8, 16  ;;  %s4489_s28 = smov [#allocation2]  }
  0x1f   : > { %v3447_v17 = vrot.slane %v233_v7, 9  ;;  %v2124_v18 = vrot.slane %v234_v8, 5  ;;  %v4615_v19 = vcombine.low %v4599_v9, %v4608_v14  ;;  %v4618_v20 = vld [vmem:[%s4593_s11 + $0x24] sm:$0xf]  ;;  %v1011_v21 = vshrl.u32 %v4599_v9, 16  ;;  %s4413_s29 = sshll.u32 %s4489_s28, 4  ;;  %s4414_s29 = int_to_ptr.vmem [resolvable:$false] %s4413_s29 }
  0x20   : > { %3759 = vmatprep.mubr.msk.bf16.mxu1 %vm367_vm3, %v4601_v10  ;;  %v1014_v22 = vshll.u32 %v4599_v9, 16  ;;  %v4625_v23 = vld [vmem:[%s4593_s11 + $0x28] sm:$0xf]  ;;  %v1024_v26 = vshrl.u32 %v4608_v14, 16  ;;  %v1035_v28 = vshrl.u32 %v4618_v20, 16  ;;  %v1038_v32 = vshll.u32 %v4618_v20, 16 }
  0x21   : > { %5869 = vst [vmem:[#allocation6_spill] sm:$0xff] %v4615_v19  ;;  %5870 = vst [vmem:[#allocation7_spill] sm:$0xff] %v4625_v23  ;;  %v2125_v25 = vsel %vm4603_vm6, %v3447_v17, %v2124_v18  ;;  %3760 = vmatmul.mubr.msk.bf16.vlgmr.msra.gmra.mrb[0].mxu1 %vm367_vm3, %v4615_v19  ;;  %v4639_v27 = vcombine.low %v4618_v20, %v4625_v23  ;;  %v4643_v29 = vld [vmem:[%s4593_s11 + $0x30] sm:$0xf]  ;;  %v4646_v30 = vld [vmem:[%s4593_s11 + $0x34] sm:$0xf] }
  0x22   : > { %5872 = vst [vmem:[#allocation9_spill] sm:$0xff] %v4643_v29  ;;  %5873 = vst [vmem:[#allocation10_spill] sm:$0xff] %v4646_v30  ;;  %v2126_v31 = vrot.slane %v2124_v18, 4  ;;  %v1048_v33 = vshrl.u32 %v4625_v23, 16  ;;  %v4652_v34 = vcombine.low %v4643_v29, %v4646_v30  ;;  %v235_v35 = vld [vmem:[%s4593_s11 + $0x14] sm:$0x1]  ;;  %3792 = vmatpush3.bf16.msra.mxu1 %v590_v6 }
  0x23   : > { %5871 = vst [vmem:[#allocation8_spill] sm:$0xff] %v4639_v27  ;;  %3763 = vmatprep.mubr.msk.bf16.mxu1 %vm367_vm3, %v4639_v27  ;;  %v989_v36 = vrot.slane %v987_v11, 4  ;;  %v992_v37 = vrot.slane %v990_v12, 5  ;;  %v996_v38 = vshll.u32 %v234_v8, 16  ;;  %v1002_v39 = vrot.slane %v1000_v16, 4  ;;  %4323 = vmatprep.subr.msk.bf16.mxu1 %vm416_vm0, %v4630_v24  ;;  %s4415_s30 = scalar_lea.vmem %s4414_s29, 4096 }
  0x24   : > { %5874 = vst [vmem:[#allocation11_spill] sm:$0xff] %v4652_v34  ;;  %v4658_v40 = vld [vmem:[%s4593_s11 + $0x20] sm:$0x1]  ;;  %v1006_v41 = vshll.u32 %v235_v35, 16  ;;  %v2127_v42 = vrot.slane %v235_v35, 5  ;;  %v1013_v43 = vrot.slane %v1011_v21, 4 }
  0x25   : > { %5875 = vst [vmem:[#allocation12_spill] sm:$0xff] %v4658_v40  ;;  %v1016_v44 = vrot.slane %v1014_v22, 5  ;;  %v4663_v45 = vld [vmem:[%s4593_s11 + $0x3c] sm:$0xf]  ;;  %v993_v46 = vor.u32 %v992_v37, %v989_v36  ;;  %v998_v47 = vrot.slane %v996_v38, 5  ;;  %v1020_v48 = vshll.u32 %v4608_v14, 16 }
  0x26   : > { %5876 = vst [vmem:[#allocation13_spill] sm:$0xff] %v4663_v45  ;;  %v1026_v49 = vrot.slane %v1024_v26, 4  ;;  %v4667_v50 = vld [vmem:[%s4593_s11 + $0x40] sm:$0xf]  ;;  %v1008_v52 = vrot.slane %v1006_v41, 5  ;;  %v2128_v53 = vsel %vm4603_vm6, %v2126_v31, %v2127_v42  ;;  %v1030_v55 = vshll.u32 %v4658_v40, 16 }
  0x27   : > { %5877 = vst [vmem:[#allocation14_spill] sm:$0xff] %v4667_v50  ;;  %v1017_v54 = vor.u32 %v1016_v44, %v1013_v43  ;;  %v994_v56 = vrot.slane %v993_v46, 4  ;;  %v1003_v57 = vor.u32 %v1002_v39, %v998_v47  ;;  %v4678_v58 = vcombine.low %v2125_v25, %v2128_v53  ;;  %v4686_v63 = vld [vmem:[%s4593_s11 + $0x48] sm:$0xf]  ;;  %v4689_v0 = vld [vmem:[%s4593_s11 + $0x4c] sm:$0xf] }
  0x28   : > { %v1022_v59 = vrot.slane %v1020_v48, 5  ;;  %v1059_v60 = vshrl.u32 %v4643_v29, 16  ;;  %v4683_v62 = vcombine.low %v4663_v45, %v4667_v50  ;;  %5881 = vst [vmem:[#allocation16_spill] sm:$0xff] %v4686_v63  ;;  %5882 = vst [vmem:[#allocation17_spill] sm:$0xff] %v4689_v0  ;;  %v1032_v5 = vrot.slane %v1030_v55, 5 }
  0x29   : > { %5880 = vst [vmem:[#allocation15_spill] sm:$0xff] %v4678_v58  ;;  %v1018_v61 = vrot.slane %v1017_v54, 4  ;;  %3764 = vmatmul.mubr.msk.bf16.gmra.mrb[4].mxu1 %vm367_vm3, %v4652_v34  ;;  %v999_v1 = vsel %vm4671_vm7, %v994_v56, %v998_v47  ;;  %v1004_v2 = vrot.slane %v1003_v57, 4  ;;  %v1062_v6 = vshll.u32 %v4643_v29, 16  ;;  %v4702_v12 = vld [vmem:[%s4593_s11 + $0x2c] sm:$0x1] }
  0x2a   : > { %v1027_v3 = vor.u32 %v1026_v49, %v1022_v59  ;;  %v1072_v7 = vshrl.u32 %v4646_v30, 16  ;;  %3767 = vmatprep.mubr.msk.bf16.mxu1 %vm367_vm3, %v4683_v62  ;;  %v1083_v8 = vshrl.u32 %v4663_v45, 16  ;;  %v1086_v11 = vshll.u32 %v4663_v45, 16  ;;  %5883 = vst [vmem:[#allocation18_spill] sm:$0xff] %v4702_v12  ;;  %v4713_v21 = vld [vmem:[%s4593_s11 + $0x38] sm:$0x1] }
  0x2b   : > { %v1009_v16 = vsel %vm4671_vm7, %v1004_v2, %v1008_v52  ;;  %v1023_v17 = vsel %vm4671_vm7, %v1018_v61, %v1022_v59  ;;  %v4710_v20 = vcombine.low %v4686_v63, %v4689_v0  ;;  %5884 = vst [vmem:[#allocation19_spill] sm:$0xff] %v4713_v21  ;;  %v1037_v25 = vrot.slane %v1035_v28, 4  ;;  %v4719_v35 = vld [vmem:[%s4593_s11 + $0x54] sm:$0xf]  ;;  %v4725_v41 = vld [vmem:[%s4593_s11 + $0x58] sm:$0xf] }
  0x2c   : > { %v1028_v18 = vrot.slane %v1027_v3, 4  ;;  %v4715_v22 = vcombine.low %v999_v1, %v1009_v16  ;;  %v1040_v26 = vrot.slane %v1038_v32, 5  ;;  %v1044_v31 = vshll.u32 %v4625_v23, 16  ;;  %5886 = vst [vmem:[#allocation21_spill] sm:$0xff] %v4719_v35  ;;  %5887 = vst [vmem:[#allocation22_spill] sm:$0xff] %v4725_v41  ;;  %v5940_v51 = vld [vmem:[#allocation9_spill] sm:$0xff] }
  0x2d   : > { %v1050_v37 = vrot.slane %v1048_v33, 4  ;;  %v1054_v38 = vshll.u32 %v4702_v12, 16  ;;  %v1061_v39 = vrot.slane %v1059_v60, 4  ;;  %v1064_v43 = vrot.slane %v1062_v6, 5  ;;  %v4736_v48 = vld [vmem:[%s5798_s1 + $0x8] sm:$0xf] }
  0x2e   : > { %5885 = vst [vmem:[#allocation20_spill] sm:$0xff] %v4715_v22  ;;  %v1033_v36 = vsel %vm4671_vm7, %v1028_v18, %v1032_v5  ;;  %3895 = vmatprep.mubr.msk.bf16.mxu0 %vm367_vm3, %v4715_v22  ;;  %v1041_v28 = vor.u32 %v1040_v26, %v1037_v25  ;;  %v1046_v32 = vrot.slane %v1044_v31, 5  ;;  %v1068_v46 = vshll.u32 %v4646_v30, 16  ;;  %v4745_v55 = vld [vmem:[%s4593_s11 + $0x60] sm:$0xf] }
  0x2f   : > { %v4729_v42 = vcombine.low %v1023_v17, %v1033_v36  ;;  %v1056_v44 = vrot.slane %v1054_v38, 5  ;;  %v1074_v47 = vrot.slane %v1072_v7, 4  ;;  %v1078_v33 = vshll.u32 %v4713_v21, 16  ;;  %5889 = vst [vmem:[#allocation24_spill] sm:$0xff] %v4745_v55  ;;  %v4754_v61 = vld [vmem:[%s4593_s11 + $0x64] sm:$0xf] }
  0x30   : > { %v1042_v49 = vrot.slane %v1041_v28, 4  ;;  %v1051_v52 = vor.u32 %v1050_v37, %v1046_v32  ;;  %v1065_v53 = vor.u32 %v1064_v43, %v1061_v39  ;;  %v4742_v54 = vcombine.low %v4719_v35, %v4725_v41  ;;  %5890 = vst [vmem:[#allocation25_spill] sm:$0xff] %v4754_v61  ;;  %v4766_v17 = vld [vmem:[%s4593_s11 + $0x44] sm:$0x1]  ;;  %v4781_v43 = vld [vmem:[%s4593_s11 + $0x50] sm:$0x1] }
  0x31   : > { %5888 = vst [vmem:[#allocation23_spill] sm:$0xff] %v4729_v42  ;;  %3896 = vmatmul.mubr.msk.bf16.vlgmr.msra.gmra.mrb[0].mxu0 %vm367_vm3, %v4729_v42  ;;  %v1096_v56 = vshrl.u32 %v4667_v50, 16  ;;  %3768 = vmatmul.mubr.msk.bf16.gmra.mrb[8].mxu1 %vm367_vm3, %v4710_v20  ;;  %v1107_v57 = vshrl.u32 %v4686_v63, 16  ;;  %v1110_v59 = vshll.u32 %v4686_v63, 16  ;;  %v1070_v60 = vrot.slane %v1068_v46, 5  ;;  %5891 = vst [vmem:[#allocation26_spill] sm:$0xff] %v4766_v17 }
  0x32   : > { %3928 = vmatpush3.bf16.msra.mxu0 %v4611_v15  ;;  %v1120_v1 = vshrl.u32 %v4689_v0, 16  ;;  %v1047_v2 = vsel %vm4671_vm7, %v1042_v49, %v1046_v32  ;;  %v1052_v3 = vrot.slane %v1051_v52, 4  ;;  %v1066_v15 = vrot.slane %v1065_v53, 4  ;;  %3771 = vmatprep.mubr.msk.bf16.mxu1 %vm367_vm3, %v4742_v54  ;;  %5893 = vst [vmem:[#allocation28_spill] sm:$0xff] %v4781_v43  ;;  %v4789_v49 = vld [vmem:[%s4593_s11 + $0x6c] sm:$0xf] }
  0x33   : > { %4328 = vmatprep.subr.msk.bf16.mxu0 %vm416_vm0, %v4736_v48  ;;  %v1075_v5 = vor.u32 %v1074_v47, %v1070_v60  ;;  %v1080_v6 = vrot.slane %v1078_v33, 5  ;;  %v1131_v7 = vshrl.u32 %v4719_v35, 16  ;;  %v1134_v16 = vshll.u32 %v4719_v35, 16  ;;  %v4792_v52 = vld [vmem:[%s4593_s11 + $0x70] sm:$0xf] }
  0x34   : > { %v1057_v18 = vsel %vm4671_vm7, %v1052_v3, %v1056_v44  ;;  %v1071_v25 = vsel %vm4671_vm7, %v1066_v15, %v1070_v60  ;;  %v4774_v26 = vcombine.low %v4745_v55, %v4754_v61  ;;  %v1085_v31 = vrot.slane %v1083_v8, 4  ;;  %v4837_v4 = vld [vmem:[%s4593_s11 + $0x84] sm:$0xf]  ;;  %v4957_v21 = vld [vmem:[%s4593_s11] sm:$0xf] }
  0x35   : > { %v4776_v36 = vcombine.low %v1047_v2, %v1057_v18  ;;  %v1076_v37 = vrot.slane %v1075_v5, 4  ;;  %v1088_v38 = vrot.slane %v1086_v11, 5  ;;  %v1092_v39 = vshll.u32 %v4667_v50, 16  ;;  %v4800_v5 = vld [vmem:[%s4593_s11 + $0x78] sm:$0xf] }
  0x36   : > { %v1098_v28 = vrot.slane %v1096_v56, 4  ;;  %v1102_v32 = vshll.u32 %v4766_v17, 16  ;;  %v1109_v44 = vrot.slane %v1107_v57, 4  ;;  %v1112_v46 = vrot.slane %v1110_v59, 5  ;;  %v4933_v35 = vld [vmem:[%s4593_s11 + $0xc4] sm:$0xf] }
  0x37   : > { %5892 = vst [vmem:[#allocation27_spill] sm:$0xff] %v4776_v36  ;;  %3899 = vmatprep.mubr.msk.bf16.mxu0 %vm367_vm3, %v4776_v36  ;;  %v1081_v8 = vsel %vm4671_vm7, %v1076_v37, %v1080_v6  ;;  %v1089_v47 = vor.u32 %v1088_v38, %v1085_v31  ;;  %v1094_v33 = vrot.slane %v1092_v39, 5  ;;  %v1116_v11 = vshll.u32 %v4689_v0, 16  ;;  %v4811_v31 = vld [vmem:[%s4593_s11 + $0x7c] sm:$0xf]  ;;  %5913 = vst [vmem:[#allocation48_spill] sm:$0xff] %v4933_v35 }
  0x38   : > { %v4794_v53 = vcombine.low %v1071_v25, %v1081_v8  ;;  %v1104_v56 = vrot.slane %v1102_v32, 5  ;;  %v1113_v57 = vor.u32 %v1112_v46, %v1109_v44  ;;  %v1122_v59 = vrot.slane %v1120_v1, 4  ;;  %v4820_v46 = vld [vmem:[%s4593_s11 + $0x5c] sm:$0x1]  ;;  %v4950_v50 = vld [vmem:[%s5798_s1 + $0x14] sm:$0xf] }
  0x39   : > { %3772 = vmatmul.mubr.msk.bf16.gmra.mrb[12].mxu1 %vm367_vm3, %v4774_v26  ;;  %v1090_v60 = vrot.slane %v1089_v47, 4  ;;  %v1099_v2 = vor.u32 %v1098_v28, %v1094_v33  ;;  %v1118_v3 = vrot.slane %v1116_v11, 5  ;;  %v1126_v15 = vshll.u32 %v4781_v43, 16  ;;  %5896 = vst [vmem:[#allocation31_spill] sm:$0xff] %v4820_v46  ;;  %5914 = vst [vmem:[#allocation49_spill] sm:$0xff] %v4950_v50 }
  0x3a   : > { %5894 = vst [vmem:[#allocation29_spill] sm:$0xff] %v4794_v53  ;;  %3900 = vmatmul.mubr.msk.bf16.gmra.mrb[4].mxu0 %vm367_vm3, %v4794_v53  ;;  %v1144_v6 = vshrl.u32 %v4725_v41, 16  ;;  %v1155_v18 = vshrl.u32 %v4745_v55, 16  ;;  %v1114_v1 = vrot.slane %v1113_v57, 4  ;;  %v4808_v25 = vcombine.low %v4789_v49, %v4792_v52  ;;  %v4831_v57 = vld [vmem:[%s4593_s11 + $0x68] sm:$0x1] }
  0x3b   : > { %v1095_v37 = vsel %vm4671_vm7, %v1090_v60, %v1094_v33  ;;  %v1100_v38 = vrot.slane %v1099_v2, 4  ;;  %v1123_v39 = vor.u32 %v1122_v59, %v1118_v3  ;;  %v1128_v28 = vrot.slane %v1126_v15, 5  ;;  %5898 = vst [vmem:[#allocation33_spill] sm:$0xff] %v4831_v57  ;;  %v4960_v29 = vld [vmem:[%s4593_s11 + $0x4] sm:$0xf] }
  0x3c   : > { %5895 = vst [vmem:[#allocation30_spill] sm:$0xff] %v4808_v25  ;;  %v1158_v32 = vshll.u32 %v4745_v55, 16  ;;  %v1168_v44 = vshrl.u32 %v4754_v61, 16  ;;  %3775 = vmatprep.mubr.msk.bf16.mxu1 %vm367_vm3, %v4808_v25  ;;  %v1119_v47 = vsel %vm4671_vm7, %v1114_v1, %v1118_v3  ;;  %v4828_v11 = vcombine.low %v4800_v5, %v4811_v31 }
  0x3d   : > { %v1105_v8 = vsel %vm4671_vm7, %v1100_v38, %v1104_v56  ;;  %v1124_v33 = vrot.slane %v1123_v39, 4  ;;  %v1133_v60 = vrot.slane %v1131_v7, 4  ;;  %v1136_v2 = vrot.slane %v1134_v16, 5  ;;  %v4843_v39 = vld [vmem:[%s4593_s11 + $0x88] sm:$0xf] }
  0x3e   : > { %5897 = vst [vmem:[#allocation32_spill] sm:$0xff] %v4828_v11  ;;  %v4833_v59 = vcombine.low %v1095_v37, %v1105_v8  ;;  %v1140_v15 = vshll.u32 %v4725_v41, 16  ;;  %v1146_v38 = vrot.slane %v1144_v6, 4  ;;  %v1150_v3 = vshll.u32 %v4820_v46, 16 }
  0x3f   : > { %v1129_v56 = vsel %vm4671_vm7, %v1124_v33, %v1128_v28  ;;  %v1157_v1 = vrot.slane %v1155_v18, 4  ;;  %v1137_v16 = vor.u32 %v1136_v2, %v1133_v60  ;;  %v1160_v8 = vrot.slane %v1158_v32, 5  ;;  %v4860_v32 = vld [vmem:[%s4593_s11 + $0x90] sm:$0xf]  ;;  %v4863_v2 = vld [vmem:[%s4593_s11 + $0x94] sm:$0xf] }
  0x40   : > { %5899 = vst [vmem:[#allocation34_spill] sm:$0xff] %v4833_v59  ;;  %3903 = vmatprep.mubr.msk.bf16.mxu0 %vm367_vm3, %v4833_v59  ;;  %v4847_v7 = vcombine.low %v1119_v47, %v1129_v56  ;;  %v1142_v37 = vrot.slane %v1140_v15, 5  ;;  %v1152_v6 = vrot.slane %v1150_v3, 5  ;;  %v1164_v18 = vshll.u32 %v4754_v61, 16  ;;  %5902 = vst [vmem:[#allocation37_spill] sm:$0xff] %v4860_v32 }
  0x41   : > { %3776 = vmatmul.mubr.msk.bf16.gmra.mrb[16].mxu1 %vm367_vm3, %v4828_v11  ;;  %v1170_v28 = vrot.slane %v1168_v44, 4  ;;  %v1174_v33 = vshll.u32 %v4831_v57, 16  ;;  %v1138_v22 = vrot.slane %v1137_v16, 4  ;;  %v1161_v56 = vor.u32 %v1160_v8, %v1157_v1  ;;  %5903 = vst [vmem:[#allocation38_spill] sm:$0xff] %v4863_v2  ;;  %v4866_v3 = vld [vmem:[%s4593_s11 + $0x9c] sm:$0xf] }
  0x42   : > { %5900 = vst [vmem:[#allocation35_spill] sm:$0xff] %v4847_v7  ;;  %3904 = vmatmul.mubr.msk.bf16.gmra.mrb[8].mxu0 %vm367_vm3, %v4847_v7  ;;  %v1147_v47 = vor.u32 %v1146_v38, %v1142_v37  ;;  %v4857_v60 = vcombine.low %v4837_v4, %v4843_v39  ;;  %v1166_v15 = vrot.slane %v1164_v18, 5  ;;  %5904 = vst [vmem:[#allocation39_spill] sm:$0xff] %v4866_v3  ;;  %v4869_v44 = vld [vmem:[%s4593_s11 + $0xa0] sm:$0xf]  ;;  %v1216_v46 = vshrl.u32 %v4811_v31, 16 }
  0x43   : > { %v1143_v57 = vsel %vm4671_vm7, %v1138_v22, %v1142_v37  ;;  %v1162_v38 = vrot.slane %v1161_v56, 4  ;;  %v1176_v16 = vrot.slane %v1174_v33, 5  ;;  %v4877_v8 = vcombine.low %v4860_v32, %v4863_v2  ;;  %v4906_v33 = vld [vmem:[%s4593_s11 + $0xb4] sm:$0xf] }
  0x44   : > { %5901 = vst [vmem:[#allocation36_spill] sm:$0xff] %v4857_v60  ;;  %v1148_v55 = vrot.slane %v1147_v47, 4  ;;  %3779 = vmatprep.mubr.msk.bf16.mxu1 %vm367_vm3, %v4857_v60  ;;  %v1171_v1 = vor.u32 %v1170_v28, %v1166_v15  ;;  %v4883_v22 = vcombine.low %v4866_v3, %v4869_v44  ;;  %v1227_v61 = vshrl.u32 %v4837_v4, 16 }
  0x45   : > { %5905 = vst [vmem:[#allocation40_spill] sm:$0xff] %v4877_v8  ;;  %v1167_v47 = vsel %vm4671_vm7, %v1162_v38, %v1166_v15  ;;  %v4909_v15 = vld [vmem:[%s4593_s11 + $0xb8] sm:$0xf]  ;;  %v1230_v41 = vshll.u32 %v4837_v4, 16  ;;  %v1188_v43 = vshll.u32 %v4792_v52, 16  ;;  %v1212_v63 = vshll.u32 %v4811_v31, 16 }
  0x46   : > { %v1153_v18 = vsel %vm4671_vm7, %v1148_v55, %v1152_v6  ;;  %5906 = vst [vmem:[#allocation41_spill] sm:$0xff] %v4883_v22  ;;  %v1172_v56 = vrot.slane %v1171_v1, 4  ;;  %v4903_v6 = vld [vmem:[%s4593_s11 + $0xac] sm:$0xf]  ;;  %5909 = vst [vmem:[#allocation44_spill] sm:$0xff] %v4909_v15  ;;  %v4921_v1 = vcombine.low %v4906_v33, %v4909_v15  ;;  %v1240_v17 = vshrl.u32 %v4843_v39, 16 }
  0x47   : > { %v4885_v37 = vcombine.low %v1143_v57, %v1153_v18  ;;  %v4900_v57 = vld [vmem:[%s4593_s11 + $0xa8] sm:$0xf]  ;;  %v1182_v18 = vshll.u32 %v4789_v49, 16  ;;  %v2326_v45 = vsel %vm416_vm0, %v4736_v48, 0  ;;  %v1236_v0 = vshll.u32 %v4843_v39, 16 }
  0x48   : > { %v1177_v28 = vsel %vm4671_vm7, %v1172_v56, %v1176_v16  ;;  %v4917_v38 = vcombine.low %v4900_v57, %v4903_v6  ;;  %5911 = vst [vmem:[#allocation46_spill] sm:$0xff] %v4921_v1  ;;  %v1179_v16 = vshrl.u32 %v4789_v49, 16  ;;  %v1192_v56 = vshrl.u32 %v4792_v52, 16 }
  0x49   : > { %5907 = vst [vmem:[#allocation42_spill] sm:$0xff] %v4885_v37  ;;  %3907 = vmatprep.mubr.msk.bf16.mxu0 %vm367_vm3, %v4885_v37  ;;  %3780 = vmatmul.mubr.msk.bf16.gmra.mrb[20].mxu1 %vm367_vm3, %v4877_v8  ;;  %v4895_v55 = vcombine.low %v1167_v47, %v1177_v28  ;;  %v4926_v47 = vld [vmem:[%s4593_s11 + $0xc0] sm:$0xf]  ;;  %v1203_v28 = vshrl.u32 %v4800_v5, 16  ;;  %v1218_v23 = vrot.slane %v1216_v46, 4  ;;  %v4969_v40 = vrot.slane %v1188_v43, 5 }
  0x4a   : > { %3783 = vmatprep.mubr.msk.bf16.mxu1 %vm367_vm3, %v4883_v22  ;;  %5910 = vst [vmem:[#allocation45_spill] sm:$0xff] %v4917_v38  ;;  %5912 = vst [vmem:[#allocation47_spill] sm:$0xff] %v4926_v47  ;;  %v4954_v58 = vcombine.low %v4926_v47, %v4933_v35  ;;  %v1181_v48 = vrot.slane %v1179_v16, 4  ;;  %v1194_v12 = vrot.slane %v1192_v56, 4  ;;  %v4972_v8 = vld [vmem:[%s4593_s11 + $0x80] sm:$0x1] }
  0x4b   : > { %5908 = vst [vmem:[#allocation43_spill] sm:$0xff] %v4895_v55  ;;  %3908 = vmatmul.mubr.msk.bf16.gmra.mrb[12].mxu0 %vm367_vm3, %v4895_v55  ;;  %v1205_v22 = vrot.slane %v1203_v28, 4  ;;  %v4974_v16 = vrot.slane %v1212_v63, 5  ;;  %v1232_v60 = vrot.slane %v1230_v41, 5  ;;  %v4978_v56 = vrot.slane %v1236_v0, 5 }
  0x4c   : > { %3929 = vmatprep.mubr.msk.bf16.mxu0 %vm367_vm3, %v4729_v42  ;;  %v1206_v42 = vshll.u32 %v4800_v5, 16  ;;  %5915 = vst [vmem:[#allocation50_spill] sm:$0xff] %v4954_v58  ;;  %v1242_v28 = vrot.slane %v1240_v17, 4  ;;  %v4985_v43 = vld [vmem:[%s4593_s11 + $0x8c] sm:$0x1]  ;;  %v1222_v41 = vshll.u32 %v4972_v8, 16  ;;  %v1195_v0 = vor.u32 %v1194_v12, %v4969_v40 }
  0x4d   : > { %5916 = vst [vmem:[#allocation51_spill] sm:$0xff] %v4985_v43  ;;  %v1219_v17 = vor.u32 %v1218_v23, %v4974_v16  ;;  %v1246_v11 = vshll.u32 %v4985_v43, 16  ;;  %v1275_v25 = vshrl.u32 %v4866_v3, 16 }
  0x4e   : > { %v1208_v30 = vrot.slane %v1206_v42, 5  ;;  %v1254_v42 = vshll.u32 %v4860_v32, 16 }
  0x4f   : > { %v1248_v43 = vrot.slane %v1246_v11, 5  ;;  %v5023_v11 = vld [vmem:[%s5798_s1 + $0x4] sm:$0xf] }
  0x50   : > { %5917 = vst [vmem:[#allocation52_spill] sm:$0xff] %v5023_v11 }
  0x51   : > { %3784 = vmatmul.mubr.msk.bf16.gmra.mrb[24].mxu1 %vm367_vm3, %v4917_v38  ;;  %v1184_v38 = vrot.slane %v1182_v18, 5  ;;  %v1229_v18 = vrot.slane %v1227_v61, 4  ;;  %v1209_v61 = vor.u32 %v1208_v30, %v1205_v22  ;;  %v1256_v30 = vrot.slane %v1254_v42, 5 }
  0x52   : > { %3787 = vmatprep.mubr.msk.bf16.mxu1 %vm367_vm3, %v4921_v1  ;;  %v4965_v1 = vld [vmem:[%s4593_s11 + $0x74] sm:$0x1]  ;;  %v1260_v22 = vshll.u32 %v4863_v2, 16 }
  0x53   : > { %3930 = vmatmul.mubr.msk.bf16.vlgmr.msra.gmra.mrb[0].mxu0 %vm367_vm3, %v4776_v36  ;;  %v3342_v36 = vcombine.low %v4957_v21, %v4960_v29  ;;  %v1185_v46 = vor.u32 %v1184_v38, %v1181_v48  ;;  %v1198_v63 = vshll.u32 %v4965_v1, 16  ;;  %v764_v38 = vsel %vm416_vm0, %v4630_v24, 0 }
  0x54   : > { %3962 = vmatpush3.bf16.msra.mxu0 %v2326_v45  ;;  %3933 = vmatprep.mubr.msk.bf16.mxu0 %vm367_vm3, %v4794_v53  ;;  %v1251_v45 = vshrl.u32 %v4860_v32, 16  ;;  %v1233_v53 = vor.u32 %v1232_v60, %v1229_v18  ;;  %v1243_v48 = vor.u32 %v1242_v28, %v4978_v56  ;;  %v1196_v24 = vrot.slane %v1195_v0, 4 }
  0x55   : > { %4329 = vmatprep.subr.msk.bf16.mxu0 %vm416_vm0, %v4950_v50  ;;  %v1264_v50 = vshrl.u32 %v4863_v2, 16  ;;  %v1186_v23 = vrot.slane %v1185_v46, 4  ;;  %v1200_v60 = vrot.slane %v1198_v63, 5  ;;  %v1210_v18 = vrot.slane %v1209_v61, 4 }
  0x56   : > { %v1253_v12 = vrot.slane %v1251_v45, 4  ;;  %v1220_v28 = vrot.slane %v1219_v17, 4  ;;  %v1234_v32 = vrot.slane %v1233_v53, 4  ;;  %v1299_v45 = vshrl.u32 %v4900_v57, 16 }
  0x57   : > { %v1244_v42 = vrot.slane %v1243_v48, 4  ;;  %v1302_v46 = vshll.u32 %v4900_v57, 16  ;;  %v1312_v63 = vshrl.u32 %v4903_v6, 16  ;;  %v1326_v0 = vshll.u32 %v4906_v33, 16 }
  0x58   : > { %v1257_v2 = vor.u32 %v1256_v30, %v1253_v12  ;;  %v1191_v53 = vsel %vm4671_vm7, %v1186_v23, %v4969_v40  ;;  %v5018_v61 = vrot.slane %v1260_v22, 5  ;;  %v1266_v17 = vrot.slane %v1264_v50, 4 }
  0x59   : > { %3788 = vmatmul.mubr.msk.bf16.gmra.mrb[28].mxu1 %vm367_vm3, %v4954_v58  ;;  %v1278_v58 = vshll.u32 %v4866_v3, 16  ;;  %v1288_v3 = vshrl.u32 %v4869_v44, 16  ;;  %v1201_v48 = vsel %vm4671_vm7, %v1196_v24, %v1200_v60  ;;  %v1215_v12 = vsel %vm4671_vm7, %v1210_v18, %v4974_v16 }
  0x5a   : > { %3793 = vmatprep.mubr.msk.bf16.mxu1 %vm367_vm3, %v3342_v36  ;;  %v1224_v36 = vrot.slane %v1222_v41, 5  ;;  %v1323_v41 = vshrl.u32 %v4906_v33, 16  ;;  %v1239_v50 = vsel %vm4671_vm7, %v1234_v32, %v4978_v56  ;;  %v1277_v23 = vrot.slane %v1275_v25, 4  ;;  %v5053_v25 = vld [vmem:[%s4593_s11 + $0xa4] sm:$0x1] }
  0x5b   : > { %3934 = vmatmul.mubr.msk.bf16.gmra.mrb[4].mxu0 %vm367_vm3, %v4833_v59  ;;  %v5012_v59 = vld [vmem:[%s4593_s11 + $0x98] sm:$0x1]  ;;  %v1280_v60 = vrot.slane %v1278_v58, 5  ;;  %v1336_v16 = vshrl.u32 %v4909_v15, 16  ;;  %v1258_v22 = vrot.slane %v1257_v2, 4  ;;  %v1284_v24 = vshll.u32 %v4869_v44, 16 }
  0x5c   : > { %3937 = vmatprep.mubr.msk.bf16.mxu0 %vm367_vm3, %v4847_v7  ;;  %v1225_v40 = vsel %vm4671_vm7, %v1220_v28, %v1224_v36  ;;  %v1270_v30 = vshll.u32 %v5012_v59, 16  ;;  %v1641_v36 = vshrl.u32 %v4926_v47, 16  ;;  %v1644_v32 = vshll.u32 %v4926_v47, 16 }
  0x5d   : > { %v1654_v56 = vshrl.u32 %v4933_v35, 16  ;;  %v1267_v58 = vor.u32 %v1266_v17, %v5018_v61  ;;  %v5058_v2 = vcombine.low %v1191_v53, %v1201_v48  ;;  %v1290_v28 = vrot.slane %v1288_v3, 4  ;;  %v5073_v48 = vld [vmem:[%s4593_s11 + $0xb0] sm:$0x1] }
  0x5e   : > { %v1332_v7 = vshll.u32 %v4909_v15, 16  ;;  %v1650_v17 = vshll.u32 %v4933_v35, 16  ;;  %v1294_v53 = vshll.u32 %v5053_v25, 16 }
  0x5f   : > { %5918 = vst [vmem:[#allocation53_spill] sm:$0xff] %v5058_v2  ;;  %v1268_v3 = vrot.slane %v1267_v58, 4 }
  0x60   : > { %v5092_v58 = vrot.slane %v1650_v17, 5 }
  0x61   : > { %3794 = vmatmul.mubr.msk.bf16.vlgmr.msra.gmra.mrb[0].mxu1 %vm367_vm3, %v4601_v10  ;;  %v1249_v10 = vsel %vm4671_vm7, %v1244_v42, %v1248_v43  ;;  %v1308_v43 = vshll.u32 %v4903_v6, 16  ;;  %v1272_v42 = vrot.slane %v1270_v30, 5  ;;  %v5078_v30 = vld [vmem:[%s4593_s11 + $0xcc] sm:$0xf] }
  0x62   : > { %3797 = vmatprep.mubr.msk.bf16.mxu1 %vm367_vm3, %v4615_v19  ;;  %3826 = vmatpush3.bf16.msra.mxu1 %v764_v38  ;;  %v5060_v38 = vcombine.low %v1215_v12, %v1225_v40  ;;  %v5062_v18 = vcombine.low %v1239_v50, %v1249_v10  ;;  %v1301_v12 = vrot.slane %v1299_v45, 4  ;;  %v1304_v40 = vrot.slane %v1302_v46, 5  ;;  %5920 = vst [vmem:[#allocation55_spill] sm:$0xff] %v5078_v30  ;;  %v5088_v45 = vld [vmem:[%s4593_s11 + $0xbc] sm:$0x1] }
  0x63   : > { %4324 = vmatprep.subr.msk.bf16.mxu1 %vm416_vm0, %v5023_v11  ;;  %3938 = vmatmul.mubr.msk.bf16.gmra.mrb[8].mxu0 %vm367_vm3, %v4885_v37  ;;  %v1281_v37 = vor.u32 %v1280_v60, %v1277_v23  ;;  %v1263_v11 = vsel %vm4671_vm7, %v1258_v22, %v5018_v61  ;;  %v5075_v50 = vrot.slane %v1308_v43, 5  ;;  %v1314_v10 = vrot.slane %v1312_v63, 4 }
  0x64   : > { %3941 = vmatprep.mubr.msk.bf16.mxu0 %vm367_vm3, %v4895_v55  ;;  %5919 = vst [vmem:[#allocation54_spill] sm:$0xff] %v5060_v38  ;;  %v5069_v55 = vrot.slane %v1284_v24, 5  ;;  %v1325_v61 = vrot.slane %v1323_v41, 4  ;;  %v1328_v23 = vrot.slane %v1326_v0, 5  ;;  %v1338_v60 = vrot.slane %v1336_v16, 4 }
  0x65   : > { %v1643_v22 = vrot.slane %v1641_v36, 4  ;;  %v5083_v24 = vld [vmem:[%s4593_s11 + $0xd0] sm:$0xf]  ;;  %v5090_v46 = vrot.slane %v1332_v7, 5  ;;  %v1646_v63 = vrot.slane %v1644_v32, 5  ;;  %v1656_v43 = vrot.slane %v1654_v56, 4 }
  0x66   : > { %5921 = vst [vmem:[#allocation56_spill] sm:$0xff] %v5083_v24  ;;  %v1282_v19 = vrot.slane %v1281_v37, 4  ;;  %v5096_v41 = vld [vmem:[%s4593_s11 + $0xc8] sm:$0x1]  ;;  %v1869_v0 = vshrl.u32 %v5078_v30, 16  ;;  %v1872_v16 = vshll.u32 %v5078_v30, 16  ;;  %v1273_v7 = vsel %vm4671_vm7, %v1268_v3, %v1272_v42 }
  0x67   : > { %v1318_v36 = vshll.u32 %v5073_v48, 16  ;;  %v1878_v32 = vshll.u32 %v5083_v24, 16  ;;  %v1882_v37 = vshrl.u32 %v5083_v24, 16  ;;  %v1305_v56 = vor.u32 %v1304_v40, %v1301_v12 }
  0x68   : > { %v1329_v17 = vor.u32 %v1328_v23, %v1325_v61  ;;  %v1342_v30 = vshll.u32 %v5088_v45, 16  ;;  %v1657_v42 = vor.u32 %v1656_v43, %v5092_v58  ;;  %v1660_v3 = vshll.u32 %v5096_v41, 16 }
  0x69   : > { %3798 = vmatmul.mubr.msk.bf16.gmra.mrb[4].mxu1 %vm367_vm3, %v4639_v27  ;;  %v1291_v27 = vor.u32 %v1290_v28, %v5069_v55  ;;  %v1315_v28 = vor.u32 %v1314_v10, %v5075_v50  ;;  %v5114_v35 = vcombine.low %v1263_v11, %v1273_v7  ;;  %v1296_v24 = vrot.slane %v1294_v53, 5 }
  0x6a   : > { %3801 = vmatprep.mubr.msk.bf16.mxu1 %vm367_vm3, %v4652_v34  ;;  %v1647_v34 = vor.u32 %v1646_v63, %v1643_v22  ;;  %v1871_v47 = vrot.slane %v1869_v0, 4  ;;  %v1874_v15 = vrot.slane %v1872_v16, 5  ;;  %v1320_v12 = vrot.slane %v1318_v36, 5  ;;  %v5121_v63 = vld [vmem:[%s4593_s11 + $0xd4] sm:$0x1] }
  0x6b   : > { %3942 = vmatmul.mubr.msk.bf16.gmra.mrb[12].mxu0 %vm367_vm3, %v5058_v2  ;;  %v1339_v2 = vor.u32 %v1338_v60, %v5090_v46  ;;  %v5116_v40 = vrot.slane %v1878_v32, 5  ;;  %v1884_v10 = vrot.slane %v1882_v37, 4  ;;  %v1306_v61 = vrot.slane %v1305_v56, 4 }
  0x6c   : > { %3945 = vmatprep.mubr.msk.bf16.mxu0 %vm367_vm3, %v5060_v38  ;;  %v1292_v38 = vrot.slane %v1291_v27, 4  ;;  %v1316_v23 = vrot.slane %v1315_v28, 4  ;;  %v1330_v60 = vrot.slane %v1329_v17, 4  ;;  %v1344_v22 = vrot.slane %v1342_v30, 5 }
  0x6d   : > { %v1340_v11 = vrot.slane %v1339_v2, 4  ;;  %v1648_v53 = vrot.slane %v1647_v34, 4  ;;  %v1658_v27 = vrot.slane %v1657_v42, 4  ;;  %v1662_v43 = vrot.slane %v1660_v3, 5  ;;  %v5135_v2 = vld [vmem:[%s4593_s11 + $0x8] sm:$0x1] }
  0x6e   : > { %v1875_v0 = vor.u32 %v1874_v15, %v1871_v47  ;;  %v2117_v16 = vrot.slane %v4960_v29, 5  ;;  %v963_v7 = vshrl.u32 %v4957_v21, 16  ;;  %v1287_v30 = vsel %vm4671_vm7, %v1282_v19, %v5069_v55 }
  0x6f   : > { %v1885_v36 = vor.u32 %v1884_v10, %v5116_v40  ;;  %v1888_v32 = vshll.u32 %v5121_v63, 16  ;;  %v1297_v34 = vsel %vm4671_vm7, %v1292_v38, %v1296_v24  ;;  %v1311_v15 = vsel %vm4671_vm7, %v1306_v61, %v5075_v50 }
  0x70   : > { %v1321_v47 = vsel %vm4671_vm7, %v1316_v23, %v1320_v12  ;;  %v1335_v19 = vsel %vm4671_vm7, %v1330_v60, %v5090_v46  ;;  %v1345_v55 = vsel %vm4671_vm7, %v1340_v11, %v1344_v22  ;;  %v1653_v37 = vsel %vm4671_vm7, %v1648_v53, %v5092_v58 }
  0x71   : > { %3802 = vmatmul.mubr.msk.bf16.gmra.mrb[8].mxu1 %vm367_vm3, %v4683_v62  ;;  %v1663_v38 = vsel %vm4671_vm7, %v1658_v27, %v1662_v43  ;;  %v3446_v24 = vrot.slane %v4957_v21, 9  ;;  %v966_v50 = vshll.u32 %v4957_v21, 16  ;;  %v5158_v56 = vrot.slane %v1875_v0, 4 }
  0x72   : > { %3805 = vmatprep.mubr.msk.bf16.mxu1 %vm367_vm3, %v4710_v20  ;;  %v2119_v28 = vrot.slane %v2117_v16, 4  ;;  %v2120_v17 = vrot.slane %v5135_v2, 5  ;;  %v976_v46 = vshrl.u32 %v4960_v29, 16  ;;  %v5162_v42 = vcombine.low %v1287_v30, %v1297_v34 }
  0x73   : > { %3946 = vmatmul.mubr.msk.bf16.gmra.mrb[16].mxu0 %vm367_vm3, %v5062_v18  ;;  %v5164_v3 = vrot.slane %v1885_v36, 4  ;;  %v1890_v12 = vrot.slane %v1888_v32, 5  ;;  %v5168_v58 = vcombine.low %v1311_v15, %v1321_v47  ;;  %v5170_v10 = vcombine.low %v1335_v19, %v1345_v55  ;;  %v5922_v32 = vld [vmem:[#allocation51_spill] sm:$0xff]  ;;  %v5923_v55 = vld [vmem:[#allocation37_spill] sm:$0xff] }
  0x74   : > { %3949 = vmatprep.mubr.msk.bf16.mxu0 %vm367_vm3, %v5114_v35  ;;  %v5172_v61 = vcombine.low %v1653_v37, %v1663_v38  ;;  %v3448_v23 = vrot.slane %v4599_v9, 9  ;;  %v5179_v60 = vsel %vm4603_vm6, %v3446_v24, %v2117_v16  ;;  %v2131_v22 = vrot.slane %v4608_v14, 5  ;;  %v5936_v14 = vld [vmem:[#allocation41_spill] sm:$0xff] }
  0x75   : > { %v3455_v11 = vrot.slane %v4789_v49, 9  ;;  %v2180_v53 = vrot.slane %v4792_v52, 5  ;;  %v1881_v27 = vsel %vm4671_vm7, %v5158_v56, %v5116_v40  ;;  %v5190_v43 = vsel %vm4603_vm6, %v2119_v28, %v2120_v17  ;;  %v5925_v28 = vld [vmem:[#allocation39_spill] sm:$0xff] }
  0x76   : > { %v2183_v0 = vrot.slane %v4965_v1, 5  ;;  %v3456_v16 = vrot.slane %v4800_v5, 9  ;;  %v1891_v49 = vsel %vm4671_vm7, %v5164_v3, %v1890_v12  ;;  %v2187_v40 = vrot.slane %v4811_v31, 5  ;;  %v5926_v12 = vld [vmem:[#allocation30_spill] sm:$0xff] }
  0x77   : > { %v2181_v52 = vsel %vm4603_vm6, %v3455_v11, %v2180_v53  ;;  %v2182_v30 = vrot.slane %v2180_v53, 4  ;;  %v2190_v1 = vrot.slane %v4972_v8, 5  ;;  %v3457_v5 = vrot.slane %v4837_v4, 9  ;;  %v5924_v4 = vld [vmem:[#allocation38_spill] sm:$0xff] }
  0x78   : > { %v2194_v36 = vrot.slane %v4843_v39, 5  ;;  %v2197_v34 = vrot.slane %v5922_v32, 5  ;;  %v2188_v47 = vsel %vm4603_vm6, %v3456_v16, %v2187_v40  ;;  %v2189_v19 = vrot.slane %v2187_v40, 4 }
  0x79   : > { %3806 = vmatmul.mubr.msk.bf16.gmra.mrb[12].mxu1 %vm367_vm3, %v4742_v54  ;;  %v2184_v15 = vsel %vm4603_vm6, %v2182_v30, %v2183_v0  ;;  %v3458_v31 = vrot.slane %v5923_v55, 9  ;;  %v2201_v24 = vrot.slane %v5924_v4, 5  ;;  %v2204_v56 = vrot.slane %v5012_v59, 5 }
  0x7a   : > { %3809 = vmatprep.mubr.msk.bf16.mxu1 %vm367_vm3, %v4774_v26  ;;  %v5213_v37 = vcombine.low %v2181_v52, %v2184_v15  ;;  %v2195_v8 = vsel %vm4603_vm6, %v3457_v5, %v2194_v36  ;;  %v2196_v38 = vrot.slane %v2194_v36, 4  ;;  %v2191_v39 = vsel %vm4603_vm6, %v2189_v19, %v2190_v1  ;;  %v5927_v52 = vld [vmem:[#allocation32_spill] sm:$0xff] }
  0x7b   : > { %3950 = vmatmul.mubr.msk.bf16.gmra.mrb[20].mxu0 %vm367_vm3, %v5162_v42  ;;  %v3459_v17 = vrot.slane %v5925_v28, 9  ;;  %v2208_v3 = vrot.slane %v4869_v44, 5  ;;  %v5225_v11 = vcombine.low %v2188_v47, %v2191_v39  ;;  %v2202_v0 = vsel %vm4603_vm6, %v3458_v31, %v2201_v24 }
  0x7c   : > { %3953 = vmatprep.mubr.msk.bf16.mxu0 %vm367_vm3, %v5168_v58  ;;  %v2198_v53 = vsel %vm4603_vm6, %v2196_v38, %v2197_v34  ;;  %v2203_v16 = vrot.slane %v2201_v24, 4  ;;  %v2211_v40 = vrot.slane %v5053_v25, 5  ;;  %v3460_v5 = vrot.slane %v4900_v57, 9  ;;  %v5928_v25 = vld [vmem:[#allocation44_spill] sm:$0xff] }
  0x7d   : > { %v5233_v59 = vcombine.low %v2195_v8, %v2198_v53  ;;  %v2209_v44 = vsel %vm4603_vm6, %v3459_v17, %v2208_v3  ;;  %v2210_v30 = vrot.slane %v2208_v3, 4  ;;  %v2215_v36 = vrot.slane %v4903_v6, 5  ;;  %v5931_v3 = vld [vmem:[#allocation40_spill] sm:$0xff] }
  0x7e   : > { %v2205_v1 = vsel %vm4603_vm6, %v2203_v16, %v2204_v56  ;;  %v2218_v32 = vrot.slane %v5073_v48, 5  ;;  %v3461_v47 = vrot.slane %v4906_v33, 9  ;;  %v2222_v19 = vrot.slane %v5928_v25, 5 }
  0x7f   : > { %v5245_v34 = vcombine.low %v2202_v0, %v2205_v1  ;;  %v2212_v15 = vsel %vm4603_vm6, %v2210_v30, %v2211_v40  ;;  %v2216_v6 = vsel %vm4603_vm6, %v3460_v5, %v2215_v36  ;;  %v2217_v48 = vrot.slane %v2215_v36, 4  ;;  %v5932_v0 = vld [vmem:[#allocation12_spill] sm:$0xff]  ;;  %v5934_v36 = vld [vmem:[#allocation7_spill] sm:$0xff] }
  0x80   : > { %v5253_v57 = vcombine.low %v2209_v44, %v2212_v15  ;;  %v2225_v55 = vrot.slane %v5088_v45, 5  ;;  %v3429_v31 = vcombine.low %v1881_v27, %v1891_v49  ;;  %v3463_v8 = vcombine.low %v5179_v60, %v5190_v43  ;;  %v5929_v49 = vld [vmem:[#allocation36_spill] sm:$0xff] }
  0x81   : > { %3810 = vmatmul.mubr.msk.bf16.gmra.mrb[16].mxu1 %vm367_vm3, %v5926_v12  ;;  %v2223_v33 = vsel %vm4603_vm6, %v3461_v47, %v2222_v19  ;;  %v2224_v38 = vrot.slane %v2222_v19, 4  ;;  %v2219_v4 = vsel %vm4603_vm6, %v2217_v48, %v2218_v32  ;;  %v965_v24 = vrot.slane %v963_v7, 4  ;;  %v5935_v19 = vld [vmem:[#allocation10_spill] sm:$0xff] }
  0x82   : > { %3813 = vmatprep.mubr.msk.bf16.mxu1 %vm367_vm3, %v5927_v52  ;;  %v968_v39 = vrot.slane %v966_v50, 5  ;;  %v972_v56 = vshll.u32 %v4960_v29, 16  ;;  %v5269_v45 = vcombine.low %v2216_v6, %v2219_v4  ;;  %v978_v27 = vrot.slane %v976_v46, 4  ;;  %v5930_v50 = vld [vmem:[#allocation47_spill] sm:$0xff]  ;;  %v5933_v46 = vld [vmem:[#allocation48_spill] sm:$0xff] }
  0x83   : > { %3954 = vmatmul.mubr.msk.bf16.gmra.mrb[24].mxu0 %vm367_vm3, %v5170_v10  ;;  %v2226_v60 = vsel %vm4603_vm6, %v2224_v38, %v2225_v55  ;;  %v982_v43 = vshll.u32 %v5135_v2, 16  ;;  %v3495_v17 = vrot.slane %v5930_v50, 9  ;;  %v2133_v53 = vrot.slane %v2131_v22, 4  ;;  %v5937_v38 = vld [vmem:[#allocation18_spill] sm:$0xff]  ;;  %v5942_v50 = vld [vmem:[#allocation15_spill] sm:$0xff] }
  0x84   : > { %3957 = vmatprep.mubr.msk.bf16.mxu0 %vm367_vm3, %v5172_v61  ;;  %v5278_v28 = vcombine.low %v2223_v33, %v2226_v60  ;;  %v969_v7 = vor.u32 %v968_v39, %v965_v24  ;;  %v974_v21 = vrot.slane %v972_v56, 5  ;;  %v2134_v29 = vrot.slane %v5932_v0, 5  ;;  %v5938_v24 = vld [vmem:[#allocation49_spill] sm:$0xff]  ;;  %v5943_v0 = vld [vmem:[#allocation14_spill] sm:$0xff] }
  0x85   : > { %v2524_v16 = vrot.slane %v5933_v46, 5  ;;  %v2527_v2 = vrot.slane %v5096_v41, 5  ;;  %v984_v40 = vrot.slane %v982_v43, 5  ;;  %v2138_v32 = vrot.slane %v5934_v36, 5  ;;  %v5939_v56 = vld [vmem:[#allocation45_spill] sm:$0xff]  ;;  %v5941_v43 = vld [vmem:[#allocation19_spill] sm:$0xff] }
  0x86   : > { %v970_v44 = vrot.slane %v969_v7, 4  ;;  %v979_v30 = vor.u32 %v978_v27, %v974_v21  ;;  %v2132_v41 = vsel %vm4603_vm6, %v3448_v23, %v2131_v22  ;;  %v2135_v25 = vsel %vm4603_vm6, %v2133_v53, %v2134_v29  ;;  %v4407_v23 = vld [vmem:[%s4593_s11 + $0x24] sm:$0xf]  ;;  %s5597_s11 = scalar_lea.vmem [#allocation2], %s3307_s10 }
  0x87   : > { %v2525_v1 = vsel %vm4603_vm6, %v3495_v17, %v2524_v16  ;;  %v2526_v5 = vrot.slane %v2524_v16, 4  ;;  %v2145_v6 = vrot.slane %v5935_v19, 5  ;;  %v5314_v9 = vcombine.low %v2132_v41, %v2135_v25  ;;  %v5948_v41 = vld [vmem:[#allocation6_spill] sm:$0xff]  ;;  %v5949_v25 = vld [vmem:[#allocation16_spill] sm:$0xff]  ;;  %s3194_s19 = sshll.u32 %s5597_s11, 4  ;;  %s5741_s19 = int_to_ptr.vmem [resolvable:$true] %s3194_s19 }
  0x88   : > { %v975_v15 = vsel %vm4671_vm7, %v970_v44, %v974_v21  ;;  %v980_v47 = vrot.slane %v979_v30, 4  ;;  %v3449_v22 = vrot.slane %v4407_v23, 9  ;;  %v2140_v33 = vrot.slane %v2138_v32, 4  ;;  %v5327_v21 = vld [vmem:[%s5798_s1 + $0x20] sm:$0xf]  ;;  %s4409_s27 = scalar_lea.vmem %s5741_s19, 2048  ;;  %p4416_p1 = scmp.lt.s32.totalorder %s5741_s19, %s4414_s29 }
  0x89   : > { %3814 = vmatmul.mubr.msk.bf16.gmra.mrb[20].mxu1 %vm367_vm3, %v5929_v49  ;;  %v2528_v48 = vsel %vm4603_vm6, %v2526_v5, %v2527_v2  ;;  %v2141_v4 = vrot.slane %v5937_v38, 5  ;;  %v2538_v39 = vsel %vm416_vm0, %v5938_v24, 0  ;;  %v3450_v60 = vrot.slane %v5940_v51, 9  ;;  %v5944_v2 = vld [vmem:[#allocation17_spill] sm:$0xff]  ;;  %p4410_p12 = scmp.ne.s32.totalorder %s5741_s19, %s4409_s27  ;;  %p4417_p2 = scmp.lt.s32.totalorder %s4415_s30, %s4409_s27 }
  0x8a   : > { %3817 = vmatprep.mubr.msk.bf16.mxu1 %vm367_vm3, %v5931_v3  ;;  %v985_v55 = vsel %vm4671_vm7, %v980_v47, %v984_v40  ;;  %v2147_v27 = vrot.slane %v2145_v6, 4  ;;  %v2148_v7 = vrot.slane %v5941_v43, 5  ;;  %v2139_v17 = vsel %vm4603_vm6, %v3449_v22, %v2138_v32  ;;  %v5945_v40 = vld [vmem:[#allocation46_spill] sm:$0xff]  ;;  %v5946_v5 = vld [vmem:[#allocation13_spill] sm:$0xff] }
  0x8b   : > { %3958 = vmatmul.mubr.msk.bf16.gmra.mrb[28].mxu0 %vm367_vm3, %v3429_v31  ;;  %v5308_v31 = vcombine.low %v2525_v1, %v2528_v48  ;;  %v2142_v53 = vsel %vm4603_vm6, %v2140_v33, %v2141_v4  ;;  %v2152_v29 = vrot.slane %v5943_v0, 5  ;;  %v2146_v46 = vsel %vm4603_vm6, %v3450_v60, %v2145_v6  ;;  %v5950_v48 = vld [vmem:[#allocation28_spill] sm:$0xff]  ;;  %v5951_v33 = vld [vmem:[#allocation22_spill] sm:$0xff]  ;;  %p4411_p13 = pnand %p4410_p12, %p4552_p4  ;;  %p4418_p3 = por %p4417_p2, %p4416_p1 }
  0x8c   : > { %3963 = vmatprep.mubr.msk.bf16.mxu0 %vm367_vm3, %v3463_v8  ;;  %v5310_v8 = vcombine.low %v975_v15, %v985_v55  ;;  %v2149_v16 = vsel %vm4603_vm6, %v2147_v27, %v2148_v7  ;;  %v2159_v44 = vrot.slane %v5944_v2, 5  ;;  %v5345_v30 = vcombine.low %v2139_v17, %v2142_v53  ;;  %v5947_v15 = vld [vmem:[#allocation26_spill] sm:$0xff]  ;;  %v5953_v60 = vld [vmem:[#allocation52_spill] sm:$0xff]  ;;  %v5955_v53 = vld [vmem:[#allocation21_spill] sm:$0xff] }
  0x8d   : > { %v5349_v1 = vcombine.low %v2146_v46, %v2149_v16  ;;  %v3451_v36 = vrot.slane %v5946_v5, 9  ;;  %v2154_v32 = vrot.slane %v2152_v29, 4  ;;  %v2155_v47 = vrot.slane %v5947_v15, 5  ;;  %v5954_v7 = vld [vmem:[#allocation8_spill] sm:$0xff]  ;;  %v5956_v46 = vld [vmem:[#allocation31_spill] sm:$0xff]  ;;  %p4412_p0 = pneg %p4411_p13 }
  0x8e   : > { %v3452_v19 = vrot.slane %v5949_v25, 9  ;;  %v2161_v6 = vrot.slane %v2159_v44, 4  ;;  %v2162_v55 = vrot.slane %v5950_v48, 5  ;;  %v2166_v38 = vrot.slane %v5951_v33, 5  ;;  %v5957_v2 = vld [vmem:[#allocation11_spill] sm:$0xff] }
  0x8f   : > { %v2153_v23 = vsel %vm4603_vm6, %v3451_v36, %v2152_v29  ;;  %v2156_v22 = vsel %vm4603_vm6, %v2154_v32, %v2155_v47  ;;  %v1445_v27 = vsel %vm416_vm0, %v5953_v60, 0  ;;  %v3453_v0 = vrot.slane %v5955_v53, 9  ;;  %v5959_v32 = vld [vmem:[#allocation33_spill] sm:$0xff]  ;;  %p4419_p5 = pnand %p4418_p3, %p4412_p0 }
  0x90   : > { %v2160_v4 = vsel %vm4603_vm6, %v3452_v19, %v2159_v44  ;;  %v2163_v24 = vsel %vm4603_vm6, %v2161_v6, %v2162_v55  ;;  %v5373_v43 = vcombine.low %v2153_v23, %v2156_v22  ;;  %v2168_v29 = vrot.slane %v2166_v38, 4  ;;  %v5958_v44 = vld [vmem:[#allocation24_spill] sm:$0xff]  ;;  %v4408_v47 = vld [vmem:[%s5798_s1 + $0x10] sm:$0xf]  ;;  %v5973_v22 = vld [vmem:[#allocation54_spill] sm:$0xff] }
  0x91   : > { %3818 = vmatmul.mubr.msk.bf16.gmra.mrb[24].mxu1 %vm367_vm3, %v5936_v14  ;;  %v5377_v17 = vcombine.low %v2160_v4, %v2163_v24  ;;  %v2169_v16 = vrot.slane %v5956_v46, 5  ;;  %v3454_v5 = vrot.slane %v5958_v44, 9  ;;  %v2176_v15 = vrot.slane %v5959_v32, 5  ;;  %v5972_v23 = vld [vmem:[#allocation53_spill] sm:$0xff] }
  0x92   : > { %3821 = vmatprep.mubr.msk.bf16.mxu1 %vm367_vm3, %v5939_v56 }
  0x93   : > { %3964 = vmatmul.mubr.msk.bf16.vlgmr.msra.gmra.mrb[0].mxu0 %vm367_vm3, %v5942_v50  ;;  %v2170_v25 = vsel %vm4603_vm6, %v2168_v29, %v2169_v16 }
  0x94   : > { %3996 = vmatpush3.bf16.msra.mxu0 %v2538_v39  ;;  %3967 = vmatprep.mubr.msk.bf16.mxu0 %vm367_vm3, %v5314_v9  ;;  %v5952_v39 = vld [vmem:[#allocation25_spill] sm:$0xff] }
  0x95   : > { %4330 = vmatprep.subr.msk.bf16.mxu0 %vm416_vm0, %v5327_v21  ;;  %v2173_v51 = vrot.slane %v5952_v39, 5  ;;  %v5589_v39 = vld [vmem:[%s5799_s2] ss:$0 sm:$0xff] }
  0x97   : > { %v2175_v36 = vrot.slane %v2173_v51, 4  ;;  %v2174_v19 = vsel %vm4603_vm6, %v3454_v5, %v2173_v51 }
  0x99   : > { %3822 = vmatmul.mubr.msk.bf16.gmra.mrb[28].mxu1 %vm367_vm3, %v5945_v40  ;;  %v2177_v6 = vsel %vm4603_vm6, %v2175_v36, %v2176_v15 }
  0x9a   : > { %3827 = vmatprep.mubr.msk.bf16.mxu1 %vm367_vm3, %v5948_v41  ;;  %v2167_v41 = vsel %vm4603_vm6, %v3453_v0, %v2166_v38  ;;  %v5405_v55 = vcombine.low %v2174_v19, %v2177_v6 }
  0x9b   : > { %3968 = vmatmul.mubr.msk.bf16.gmra.mrb[4].mxu0 %vm367_vm3, %v5345_v30  ;;  %v5401_v48 = vcombine.low %v2167_v41, %v2170_v25 }
  0x9c   : > { %3971 = vmatprep.mubr.msk.bf16.mxu0 %vm367_vm3, %v5349_v1 }
  0xa1   : > { %3828 = vmatmul.mubr.msk.bf16.vlgmr.msra.gmra.mrb[0].mxu1 %vm367_vm3, %v5954_v7 }
  0xa2   : > { %3831 = vmatprep.mubr.msk.bf16.mxu1 %vm367_vm3, %v5957_v2  ;;  %3860 = vmatpush3.bf16.msra.mxu1 %v1445_v27 }
  0xa3   : > { %4326 = vmatprep.subr.msk.bf16.mxu1 %vm416_vm0, %v4408_v47  ;;  %3972 = vmatmul.mubr.msk.bf16.gmra.mrb[8].mxu0 %vm367_vm3, %v5373_v43 }
  0xa4   : > { %3975 = vmatprep.mubr.msk.bf16.mxu0 %vm367_vm3, %v5377_v17 }
  0xa9   : > { %3832 = vmatmul.mubr.msk.bf16.gmra.mrb[4].mxu1 %vm367_vm3, %v4683_v62  ;;  %v2750_v62 = vsel %vm416_vm0, %v5327_v21, 0  ;;  %v5969_v21 = vld [vmem:[#allocation35_spill] sm:$0xff] }
  0xaa   : > { %3835 = vmatprep.mubr.msk.bf16.mxu1 %vm367_vm3, %v4710_v20  ;;  %v5960_v20 = vld [vmem:[#allocation50_spill] sm:$0xff] }
  0xab   : > { %3976 = vmatmul.mubr.msk.bf16.gmra.mrb[12].mxu0 %vm367_vm3, %v5401_v48 }
  0xac   : > { %3979 = vmatprep.mubr.msk.bf16.mxu0 %vm367_vm3, %v5405_v55 }
  0xb1   : > { %3836 = vmatmul.mubr.msk.bf16.gmra.mrb[8].mxu1 %vm367_vm3, %v4742_v54  ;;  %v5961_v54 = vld [vmem:[#allocation56_spill] sm:$0xff] }
  0xb2   : > { %3839 = vmatprep.mubr.msk.bf16.mxu1 %vm367_vm3, %v4774_v26  ;;  %v5962_v26 = vld [vmem:[#allocation55_spill] sm:$0xff] }
  0xb3   : > { %3980 = vmatmul.mubr.msk.bf16.gmra.mrb[16].mxu0 %vm367_vm3, %v5213_v37 }
  0xb4   : > { %3983 = vmatprep.mubr.msk.bf16.mxu0 %vm367_vm3, %v5225_v11 }
  0xb9   : > { %3840 = vmatmul.mubr.msk.bf16.gmra.mrb[12].mxu1 %vm367_vm3, %v5926_v12  ;;  %v3360_v12 = vcombine.low %v5962_v26, %v5961_v54 }
  0xba   : > { %3843 = vmatprep.mubr.msk.bf16.mxu1 %vm367_vm3, %v5927_v52  ;;  %v5963_v52 = vld [vmem:[#allocation20_spill] sm:$0xff] }
  0xbb   : > { %3984 = vmatmul.mubr.msk.bf16.gmra.mrb[20].mxu0 %vm367_vm3, %v5233_v59 }
  0xbc   : > { %3987 = vmatprep.mubr.msk.bf16.mxu0 %vm367_vm3, %v5245_v34 }
  0xc1   : > { %3844 = vmatmul.mubr.msk.bf16.gmra.mrb[16].mxu1 %vm367_vm3, %v5929_v49  ;;  %v5964_v49 = vld [vmem:[#allocation23_spill] sm:$0xff] }
  0xc2   : > { %3847 = vmatprep.mubr.msk.bf16.mxu1 %vm367_vm3, %v5931_v3  ;;  %v5965_v3 = vld [vmem:[#allocation5_spill] sm:$0xff] }
  0xc3   : > { %3988 = vmatmul.mubr.msk.bf16.gmra.mrb[24].mxu0 %vm367_vm3, %v5253_v57 }
  0xc4   : > { %3991 = vmatprep.mubr.msk.bf16.mxu0 %vm367_vm3, %v5269_v45 }
  0xc9   : > { %3848 = vmatmul.mubr.msk.bf16.gmra.mrb[20].mxu1 %vm367_vm3, %v5936_v14  ;;  %v5967_v14 = vld [vmem:[#allocation29_spill] sm:$0xff] }
  0xca   : > { %3851 = vmatprep.mubr.msk.bf16.mxu1 %vm367_vm3, %v5939_v56  ;;  %v5968_v56 = vld [vmem:[#allocation34_spill] sm:$0xff] }
  0xcb   : > { %3992 = vmatmul.mubr.msk.bf16.gmra.mrb[28].mxu0 %vm367_vm3, %v5278_v28 }
  0xcc   : > { %3997 = vmatprep.mubr.msk.bf16.mxu0 %vm367_vm3, %v5942_v50  ;;  %v5970_v50 = vld [vmem:[#allocation42_spill] sm:$0xff] }
  0xd1   : > { %3852 = vmatmul.mubr.msk.bf16.gmra.mrb[24].mxu1 %vm367_vm3, %v5945_v40  ;;  %v5971_v40 = vld [vmem:[#allocation43_spill] sm:$0xff] }
  0xd2   : > { %3855 = vmatprep.mubr.msk.bf16.mxu1 %vm367_vm3, %v5960_v20 }
  0xd3   : > { %3998 = vmatmul.mubr.msk.bf16.vlgmr.msra.gmra.mrb[0].mxu0 %vm367_vm3, %v5314_v9 }
  0xd4   : > { %4030 = vmatpush3.bf16.msra.mxu0 %v2750_v62  ;;  %4001 = vmatprep.mubr.msk.bf16.mxu0 %vm367_vm3, %v5345_v30 }
  0xd9   : > { %3856 = vmatmul.mubr.msk.bf16.gmra.mrb[28].mxu1 %vm367_vm3, %v3360_v12 }
  0xda   : > { %3861 = vmatprep.mubr.msk.bf16.mxu1 %vm367_vm3, %v5310_v8  ;;  %v5966_v8 = vld [vmem:[#allocation27_spill] sm:$0xff] }
  0xdb   : > { %4002 = vmatmul.mubr.msk.bf16.gmra.mrb[4].mxu0 %vm367_vm3, %v5349_v1 }
  0xdc   : > { %4005 = vmatprep.mubr.msk.bf16.mxu0 %vm367_vm3, %v5373_v43 }
  0xe1   : > { %3862 = vmatmul.mubr.msk.bf16.vlgmr.msra.gmra.mrb[0].mxu1 %vm367_vm3, %v5963_v52 }
  0xe2   : > { %3865 = vmatprep.mubr.msk.bf16.mxu1 %vm367_vm3, %v5964_v49  ;;  %4064 = vmatpush3.bf16.msra.mxu1 %v5965_v3 }
  0xe3   : > { %4006 = vmatmul.mubr.msk.bf16.gmra.mrb[8].mxu0 %vm367_vm3, %v5377_v17 }
  0xe4   : > { %4009 = vmatprep.mubr.msk.bf16.mxu0 %vm367_vm3, %v5401_v48 }
  0xe9   : > { %3866 = vmatmul.mubr.msk.bf16.gmra.mrb[4].mxu1 %vm367_vm3, %v5966_v8 }
  0xea   : > { %3869 = vmatprep.mubr.msk.bf16.mxu1 %vm367_vm3, %v5967_v14 }
  0xeb   : > { %4010 = vmatmul.mubr.msk.bf16.gmra.mrb[12].mxu0 %vm367_vm3, %v5405_v55 }
  0xec   : > { %4013 = vmatprep.mubr.msk.bf16.mxu0 %vm367_vm3, %v5213_v37 }
  0xf1   : > { %3870 = vmatmul.mubr.msk.bf16.gmra.mrb[8].mxu1 %vm367_vm3, %v5968_v56 }
  0xf2   : > { %3873 = vmatprep.mubr.msk.bf16.mxu1 %vm367_vm3, %v5969_v21 }
  0xf3   : > { %4014 = vmatmul.mubr.msk.bf16.gmra.mrb[16].mxu0 %vm367_vm3, %v5225_v11 }
  0xf4   : > { %4017 = vmatprep.mubr.msk.bf16.mxu0 %vm367_vm3, %v5233_v59 }
  0xf9   : > { %3874 = vmatmul.mubr.msk.bf16.gmra.mrb[12].mxu1 %vm367_vm3, %v5970_v50 }
  0xfa   : > { %3877 = vmatprep.mubr.msk.bf16.mxu1 %vm367_vm3, %v5971_v40 }
  0xfb   : > { %4018 = vmatmul.mubr.msk.bf16.gmra.mrb[20].mxu0 %vm367_vm3, %v5245_v34 }
  0xfc   : > { %4021 = vmatprep.mubr.msk.bf16.mxu0 %vm367_vm3, %v5253_v57 }
 0x101   : > { %3878 = vmatmul.mubr.msk.bf16.gmra.mrb[16].mxu1 %vm367_vm3, %v5972_v23 }
 0x102   : > { %3881 = vmatprep.mubr.msk.bf16.mxu1 %vm367_vm3, %v5973_v22 }
 0x103   : > { %4022 = vmatmul.mubr.msk.bf16.gmra.mrb[24].mxu0 %vm367_vm3, %v5269_v45 }
 0x104   : > { %4025 = vmatprep.mubr.msk.bf16.mxu0 %vm367_vm3, %v5278_v28 }
 0x109   : > { %3882 = vmatmul.mubr.msk.bf16.gmra.mrb[20].mxu1 %vm367_vm3, %v5062_v18 }
 0x10a   : > { %3885 = vmatprep.mubr.msk.bf16.mxu1 %vm367_vm3, %v5114_v35 }
 0x10b   : > { %4026 = vmatmul.mubr.msk.bf16.gmra.mrb[28].mxu0 %vm367_vm3, %v5308_v31 }
 0x10c   : > { %4031 = vmatprep.mubr.msk.bf16.mxu0 %vm367_vm3, %v5314_v9 }
 0x111   : > { %3886 = vmatmul.mubr.msk.bf16.gmra.mrb[24].mxu1 %vm367_vm3, %v5162_v42 }
 0x112   : > { %3889 = vmatprep.mubr.msk.bf16.mxu1 %vm367_vm3, %v5168_v58 }
 0x113   : > { %4032 = vmatmul.mubr.msk.bf16.vlgmr.msra.gmra.mrb[0].mxu0 %vm367_vm3, %v5345_v30 }
 0x114   : > { %4035 = vmatprep.mubr.msk.bf16.mxu0 %vm367_vm3, %v5349_v1 }
 0x119   : > { %3890 = vmatmul.mubr.msk.bf16.gmra.mrb[28].mxu1 %vm367_vm3, %v5170_v10 }
 0x11a   : > { %3911 = vmatprep.mubr.msk.bf16.mxu1 %vm367_vm3, %v5972_v23 }
 0x11b   : > { %4036 = vmatmul.mubr.msk.bf16.gmra.mrb[4].mxu0 %vm367_vm3, %v5373_v43 }
 0x11c   : > { %4039 = vmatprep.mubr.msk.bf16.mxu0 %vm367_vm3, %v5377_v17 }
 0x121   : > { %3912 = vmatmul.mubr.msk.bf16.vlgmr.msra.gmra.mrb[16].mxu1 %vm367_vm3, %v5973_v22 }
 0x122   : > { %3915 = vmatprep.mubr.msk.bf16.mxu1 %vm367_vm3, %v5062_v18  ;;  %v3514_v18 = vrot.slane %v5962_v26, 9 }
 0x123   : > { %4040 = vmatmul.mubr.msk.bf16.gmra.mrb[8].mxu0 %vm367_vm3, %v5401_v48 }
 0x124   : > { %4043 = vmatprep.mubr.msk.bf16.mxu0 %vm367_vm3, %v5405_v55 }
 0x129   : > { %3916 = vmatmul.mubr.msk.bf16.gmra.mrb[20].mxu1 %vm367_vm3, %v5114_v35  ;;  %v2736_v35 = vrot.slane %v5961_v54, 5 }
 0x12a   : > { %3919 = vmatprep.mubr.msk.bf16.mxu1 %vm367_vm3, %v5162_v42 }
 0x12b   : > { %4044 = vmatmul.mubr.msk.bf16.gmra.mrb[12].mxu0 %vm367_vm3, %v5213_v37  ;;  %v2738_v42 = vrot.slane %v2736_v35, 4 }
 0x12c   : > { %4047 = vmatprep.mubr.msk.bf16.mxu0 %vm367_vm3, %v5225_v11 }
 0x131   : > { %3920 = vmatmul.mubr.msk.bf16.gmra.mrb[24].mxu1 %vm367_vm3, %v5168_v58  ;;  %v2739_v58 = vrot.slane %v5121_v63, 5 }
 0x132   : > { %3923 = vmatprep.mubr.msk.bf16.mxu1 %vm367_vm3, %v5170_v10  ;;  %v2737_v10 = vsel %vm4603_vm6, %v3514_v18, %v2736_v35 }
 0x133   : > { %4048 = vmatmul.mubr.msk.bf16.gmra.mrb[16].mxu0 %vm367_vm3, %v5233_v59 }
 0x134   : > { %4051 = vmatprep.mubr.msk.bf16.mxu0 %vm367_vm3, %v5245_v34 }
 0x139   : > { %3924 = vmatmul.mubr.msk.bf16.gmra.mrb[28].mxu1 %vm367_vm3, %v5172_v61  ;;  %v2740_v61 = vsel %vm4603_vm6, %v2738_v42, %v2739_v58 }
 0x13a   : > { %v3516_v37 = vcombine.low %v2737_v10, %v2740_v61 }
 0x13b   : > { %4052 = vmatmul.mubr.msk.bf16.gmra.mrb[20].mxu0 %vm367_vm3, %v5253_v57 }
 0x13c   : > { %4055 = vmatprep.mubr.msk.bf16.mxu0 %vm367_vm3, %v5269_v45 }
 0x143   : > { %4056 = vmatmul.mubr.msk.bf16.gmra.mrb[24].mxu0 %vm367_vm3, %v5278_v28 }
 0x144   : > { %4059 = vmatprep.mubr.msk.bf16.mxu0 %vm367_vm3, %v5308_v31 }
 0x14b   : > { %4060 = vmatmul.mubr.msk.bf16.gmra.mrb[28].mxu0 %vm367_vm3, %v3516_v37 }
 0x1b4   : > { %v3863_v11 = vpop.f32.mrb[0].mxu1 }
 0x1b5   : > { %v1481_v59 = vpop.f32.mrb[1].mxu1 }
 0x1b6   : > { %v3864_v34 = vpop.f32.mrb[2].mxu1 }
 0x1b7   : > { %v1484_v63 = vpop.f32.mrb[3].mxu1 }
 0x1bc   : > { %v3867_v57 = vpop.f32.mrb[4].mxu1 }
 0x1bd   : > { %v1497_v45 = vpop.f32.mrb[5].mxu1 }
 0x1be   : > { %v3868_v28 = vpop.f32.mrb[6].mxu1 }
 0x1bf   : > { %v1500_v9 = vpop.f32.mrb[7].mxu1 }
 0x1c4   : > { %v3871_v31 = vpop.f32.mrb[8].mxu1 }
 0x1c5   : > { %v5571_v30 = vpop.f32.mrb[9].mxu1 }
 0x1c6   : > { %v5573_v1 = vpop.f32.mrb[10].mxu1 }
 0x1c7   : > { %v5575_v13 = vpop.f32.mrb[11].mxu1 }
 0x1cc   : > { %v5577_v33 = vpop.f32.mrb[12].mxu1 }
 0x1cd   : > { %v5579_v38 = vpop.f32.mrb[13].mxu1 }
 0x1ce   : > { %v5581_v4 = vpop.f32.mrb[14].mxu1 }
 0x1cf   : > { %v5583_v24 = vpop.f32.mrb[15].mxu1 }
 0x1e6   : > { %v4033_v51 = vpop.f32.mrb[0].mxu0 }
 0x1e7   : > { %v4065_v60 = vadd.f32 %v4033_v51, %v3863_v11  ;;  %v2786_v27 = vpop.f32.mrb[1].mxu0 }
 0x1e8   : > { %v4066_v43 = vadd.f32 %v2786_v27, %v1481_v59  ;;  %v4034_v7 = vpop.f32.mrb[2].mxu0 }
 0x1e9   : > { %v2953_v17 = vadd.f32 %v4065_v60, %v5589_v39  ;;  %v4067_v53 = vadd.f32 %v4034_v7, %v3864_v34  ;;  %v2789_v0 = vpop.f32.mrb[3].mxu0 }
 0x1ea   : > { %v2951_v29 = vadd.f32 %v4066_v43, %v5589_v39  ;;  %v4068_v46 = vadd.f32 %v2789_v0, %v1484_v63 }
 0x1eb   : > { %v2985_v16 = vmax.f32 %v2953_v17, 0.0  ;;  %v2954_v2 = vadd.f32 %v4067_v53, %v5589_v39 }
 0x1ec   : > { %v2983_v44 = vmax.f32 %v2951_v29, 0.0  ;;  %v2952_v5 = vadd.f32 %v4068_v46, %v5589_v39 }
 0x1ed   : > { %v3573_v36 = vpack.c.bf16 %v2985_v16, %v2985_v16  ;;  %v2986_v32 = vmax.f32 %v2954_v2, 0.0 }
 0x1ee   : > { %v3571_v15 = vpack.c.bf16 %v2983_v44, %v2983_v44  ;;  %v2984_v47 = vmax.f32 %v2952_v5, 0.0  ;;  %v4037_v41 = vpop.f32.mrb[4].mxu0 }
 0x1ef   : > { %3146 = vst.msk [vmem:[%s5597_s11 + $0x8] sm:$0xf] %vm3143_vm8, %v3573_v36  ;;  %v3574_v25 = vpack.c.bf16 %v2986_v32, %v2986_v32  ;;  %v4069_v19 = vadd.f32 %v4037_v41, %v3867_v57  ;;  %v2802_v6 = vpop.f32.mrb[5].mxu0 }
 0x1f0   : > { %3144 = vst.msk [vmem:[%s5597_s11] sm:$0xf] %vm3143_vm8, %v3571_v15  ;;  %v3572_v48 = vpack.c.bf16 %v2984_v47, %v2984_v47  ;;  %v4070_v55 = vadd.f32 %v2802_v6, %v1497_v45  ;;  %v4038_v62 = vpop.f32.mrb[6].mxu0 }
 0x1f1   : > { %3147 = vst.msk [vmem:[%s5597_s11 + $0xc] sm:$0xf] %vm3143_vm8, %v3574_v25  ;;  %v2957_v20 = vadd.f32 %v4069_v19, %v5589_v39  ;;  %v4071_v54 = vadd.f32 %v4038_v62, %v3868_v28  ;;  %v2805_v26 = vpop.f32.mrb[7].mxu0 }
 0x1f2   : > { %3145 = vst.msk [vmem:[%s5597_s11 + $0x4] sm:$0xf] %vm3143_vm8, %v3572_v48  ;;  %v2955_v12 = vadd.f32 %v4070_v55, %v5589_v39  ;;  %v4072_v52 = vadd.f32 %v2805_v26, %v1500_v9 }
 0x1f3   : > { %v2989_v49 = vmax.f32 %v2957_v20, 0.0  ;;  %v2958_v3 = vadd.f32 %v4071_v54, %v5589_v39 }
 0x1f4   : > { %v5610_v8 = vpop.f32.mrb[16].mxu1  ;;  %v2987_v14 = vmax.f32 %v2955_v12, 0.0  ;;  %v2956_v56 = vadd.f32 %v4072_v52, %v5589_v39 }
 0x1f5   : > { %v5613_v21 = vpop.f32.mrb[17].mxu1  ;;  %v3577_v50 = vpack.c.bf16 %v2989_v49, %v2989_v49  ;;  %v2990_v40 = vmax.f32 %v2958_v3, 0.0 }
 0x1f6   : > { %v5615_v23 = vpop.f32.mrb[18].mxu1  ;;  %v3575_v22 = vpack.c.bf16 %v2987_v14, %v2987_v14  ;;  %v2988_v35 = vmax.f32 %v2956_v56, 0.0  ;;  %v4041_v18 = vpop.f32.mrb[8].mxu0 }
 0x1f7   : > { %v5617_v42 = vpop.f32.mrb[19].mxu1  ;;  %3150 = vst.msk [vmem:[%s5597_s11 + $0x18] sm:$0xf] %vm3143_vm8, %v3577_v50  ;;  %v3578_v58 = vpack.c.bf16 %v2990_v40, %v2990_v40  ;;  %v4073_v10 = vadd.f32 %v4041_v18, %v3871_v31  ;;  %v2818_v61 = vpop.f32.mrb[9].mxu0 }
 0x1f8   : > { %3148 = vst.msk [vmem:[%s5597_s11 + $0x10] sm:$0xf] %vm3143_vm8, %v3575_v22  ;;  %v3576_v37 = vpack.c.bf16 %v2988_v35, %v2988_v35  ;;  %v4074_v11 = vadd.f32 %v2818_v61, %v5571_v30  ;;  %v4042_v59 = vpop.f32.mrb[10].mxu0 }
 0x1f9   : > { %3151 = vst.msk [vmem:[%s5597_s11 + $0x1c] sm:$0xf] %vm3143_vm8, %v3578_v58  ;;  %v2961_v34 = vadd.f32 %v4073_v10, %v5589_v39  ;;  %v4075_v63 = vadd.f32 %v4042_v59, %v5573_v1  ;;  %v2821_v57 = vpop.f32.mrb[11].mxu0 }
 0x1fa   : > { %3149 = vst.msk [vmem:[%s5597_s11 + $0x14] sm:$0xf] %vm3143_vm8, %v3576_v37  ;;  %v2959_v45 = vadd.f32 %v4074_v11, %v5589_v39  ;;  %v4076_v28 = vadd.f32 %v2821_v57, %v5575_v13 }
 0x1fb   : > { %v2993_v9 = vmax.f32 %v2961_v34, 0.0  ;;  %v2962_v31 = vadd.f32 %v4075_v63, %v5589_v39 }
 0x1fc   : > { %v5633_v30 = vpop.f32.mrb[20].mxu1  ;;  %v2991_v51 = vmax.f32 %v2959_v45, 0.0  ;;  %v2960_v60 = vadd.f32 %v4076_v28, %v5589_v39 }
 0x1fd   : > { %v5636_v27 = vpop.f32.mrb[21].mxu1  ;;  %v3581_v1 = vpack.c.bf16 %v2993_v9, %v2993_v9  ;;  %v2994_v43 = vmax.f32 %v2962_v31, 0.0 }
 0x1fe   : > { %v5638_v7 = vpop.f32.mrb[22].mxu1  ;;  %v3579_v17 = vpack.c.bf16 %v2991_v51, %v2991_v51  ;;  %v2992_v53 = vmax.f32 %v2960_v60, 0.0  ;;  %v4045_v13 = vpop.f32.mrb[12].mxu0 }
 0x1ff   : > { %v5640_v0 = vpop.f32.mrb[23].mxu1  ;;  %3154 = vst.msk [vmem:[%s5597_s11 + $0x28] sm:$0xf] %vm3143_vm8, %v3581_v1  ;;  %v3582_v29 = vpack.c.bf16 %v2994_v43, %v2994_v43  ;;  %v4077_v46 = vadd.f32 %v4045_v13, %v5577_v33  ;;  %v2834_v16 = vpop.f32.mrb[13].mxu0 }
 0x200   : > { %3152 = vst.msk [vmem:[%s5597_s11 + $0x20] sm:$0xf] %vm3143_vm8, %v3579_v17  ;;  %v3580_v2 = vpack.c.bf16 %v2992_v53, %v2992_v53  ;;  %v4078_v44 = vadd.f32 %v2834_v16, %v5579_v38  ;;  %v4046_v5 = vpop.f32.mrb[14].mxu0 }
 0x201   : > { %3155 = vst.msk [vmem:[%s5597_s11 + $0x2c] sm:$0xf] %vm3143_vm8, %v3582_v29  ;;  %v2965_v36 = vadd.f32 %v4077_v46, %v5589_v39  ;;  %v4079_v32 = vadd.f32 %v4046_v5, %v5581_v4  ;;  %v2837_v15 = vpop.f32.mrb[15].mxu0 }
 0x202   : > { %3153 = vst.msk [vmem:[%s5597_s11 + $0x24] sm:$0xf] %vm3143_vm8, %v3580_v2  ;;  %v2963_v47 = vadd.f32 %v4078_v44, %v5589_v39  ;;  %v4080_v33 = vadd.f32 %v2837_v15, %v5583_v24 }
 0x203   : > { %v2997_v41 = vmax.f32 %v2965_v36, 0.0  ;;  %v2966_v25 = vadd.f32 %v4079_v32, %v5589_v39 }
 0x204   : > { %v5657_v38 = vpop.f32.mrb[24].mxu1  ;;  %v2995_v19 = vmax.f32 %v2963_v47, 0.0  ;;  %v2964_v6 = vadd.f32 %v4080_v33, %v5589_v39 }
 0x205   : > { %v5660_v48 = vpop.f32.mrb[25].mxu1  ;;  %v3585_v4 = vpack.c.bf16 %v2997_v41, %v2997_v41  ;;  %v2998_v55 = vmax.f32 %v2966_v25, 0.0 }
 0x206   : > { %v5662_v62 = vpop.f32.mrb[26].mxu1  ;;  %v3583_v20 = vpack.c.bf16 %v2995_v19, %v2995_v19  ;;  %v2996_v54 = vmax.f32 %v2964_v6, 0.0  ;;  %v4049_v24 = vpop.f32.mrb[16].mxu0 }
 0x207   : > { %v5664_v26 = vpop.f32.mrb[27].mxu1  ;;  %3158 = vst.msk [vmem:[%s5597_s11 + $0x38] sm:$0xf] %vm3143_vm8, %v3585_v4  ;;  %v3586_v12 = vpack.c.bf16 %v2998_v55, %v2998_v55  ;;  %v4081_v52 = vadd.f32 %v4049_v24, %v5610_v8  ;;  %v2850_v49 = vpop.f32.mrb[17].mxu0 }
 0x208   : > { %3156 = vst.msk [vmem:[%s5597_s11 + $0x30] sm:$0xf] %vm3143_vm8, %v3583_v20  ;;  %v3584_v3 = vpack.c.bf16 %v2996_v54, %v2996_v54  ;;  %v4082_v14 = vadd.f32 %v2850_v49, %v5613_v21  ;;  %v4050_v56 = vpop.f32.mrb[18].mxu0 }
 0x209   : > { %3159 = vst.msk [vmem:[%s5597_s11 + $0x3c] sm:$0xf] %vm3143_vm8, %v3586_v12  ;;  %v2969_v50 = vadd.f32 %v4081_v52, %v5589_v39  ;;  %v4083_v40 = vadd.f32 %v4050_v56, %v5615_v23  ;;  %v2853_v22 = vpop.f32.mrb[19].mxu0 }
 0x20a   : > { %3157 = vst.msk [vmem:[%s5597_s11 + $0x34] sm:$0xf] %vm3143_vm8, %v3584_v3  ;;  %v2967_v35 = vadd.f32 %v4082_v14, %v5589_v39  ;;  %v4084_v8 = vadd.f32 %v2853_v22, %v5617_v42 }
 0x20b   : > { %v3001_v18 = vmax.f32 %v2969_v50, 0.0  ;;  %v2970_v58 = vadd.f32 %v4083_v40, %v5589_v39 }
 0x20c   : > { %v3925_v21 = vpop.f32.mrb[28].mxu1  ;;  %v2999_v10 = vmax.f32 %v2967_v35, 0.0  ;;  %v2968_v61 = vadd.f32 %v4084_v8, %v5589_v39 }
 0x20d   : > { %v1821_v37 = vpop.f32.mrb[29].mxu1  ;;  %v3589_v11 = vpack.c.bf16 %v3001_v18, %v3001_v18  ;;  %v3002_v23 = vmax.f32 %v2970_v58, 0.0 }
 0x20e   : > { %v5682_v59 = vpop.f32.mrb[30].mxu1  ;;  %v3587_v34 = vpack.c.bf16 %v2999_v10, %v2999_v10  ;;  %v3000_v63 = vmax.f32 %v2968_v61, 0.0  ;;  %v4053_v57 = vpop.f32.mrb[20].mxu0 }
 0x20f   : > { %v5684_v45 = vpop.f32.mrb[31].mxu1  ;;  %3162 = vst.msk [vmem:[%s5597_s11 + $0x48] sm:$0xf] %vm3143_vm8, %v3589_v11  ;;  %v3590_v42 = vpack.c.bf16 %v3002_v23, %v3002_v23  ;;  %v4085_v28 = vadd.f32 %v4053_v57, %v5633_v30  ;;  %v2866_v9 = vpop.f32.mrb[21].mxu0 }
 0x210   : > { %3160 = vst.msk [vmem:[%s5597_s11 + $0x40] sm:$0xf] %vm3143_vm8, %v3587_v34  ;;  %v3588_v31 = vpack.c.bf16 %v3000_v63, %v3000_v63  ;;  %v4086_v51 = vadd.f32 %v2866_v9, %v5636_v27  ;;  %v4054_v60 = vpop.f32.mrb[22].mxu0 }
 0x211   : > { %3163 = vst.msk [vmem:[%s5597_s11 + $0x4c] sm:$0xf] %vm3143_vm8, %v3590_v42  ;;  %v2973_v1 = vadd.f32 %v4085_v28, %v5589_v39  ;;  %v4087_v43 = vadd.f32 %v4054_v60, %v5638_v7  ;;  %v2869_v17 = vpop.f32.mrb[23].mxu0 }
 0x212   : > { %3161 = vst.msk [vmem:[%s5597_s11 + $0x44] sm:$0xf] %vm3143_vm8, %v3588_v31  ;;  %v2971_v30 = vadd.f32 %v4086_v51, %v5589_v39  ;;  %v4088_v53 = vadd.f32 %v2869_v17, %v5640_v0 }
 0x213   : > { %v3005_v13 = vmax.f32 %v2973_v1, 0.0  ;;  %v2974_v29 = vadd.f32 %v4087_v43, %v5589_v39 }
 0x214   : > { %v3003_v27 = vmax.f32 %v2971_v30, 0.0  ;;  %v2972_v46 = vadd.f32 %v4088_v53, %v5589_v39 }
 0x215   : > { %v3593_v16 = vpack.c.bf16 %v3005_v13, %v3005_v13  ;;  %v3006_v2 = vmax.f32 %v2974_v29, 0.0 }
 0x216   : > { %v3591_v44 = vpack.c.bf16 %v3003_v27, %v3003_v27  ;;  %v3004_v7 = vmax.f32 %v2972_v46, 0.0  ;;  %v4057_v5 = vpop.f32.mrb[24].mxu0 }
 0x217   : > { %3166 = vst.msk [vmem:[%s5597_s11 + $0x58] sm:$0xf] %vm3143_vm8, %v3593_v16  ;;  %v3594_v36 = vpack.c.bf16 %v3006_v2, %v3006_v2  ;;  %v4089_v32 = vadd.f32 %v4057_v5, %v5657_v38  ;;  %v2882_v15 = vpop.f32.mrb[25].mxu0 }
 0x218   : > { %3164 = vst.msk [vmem:[%s5597_s11 + $0x50] sm:$0xf] %vm3143_vm8, %v3591_v44  ;;  %v3592_v0 = vpack.c.bf16 %v3004_v7, %v3004_v7  ;;  %v4090_v47 = vadd.f32 %v2882_v15, %v5660_v48  ;;  %v4058_v33 = vpop.f32.mrb[26].mxu0 }
 0x219   : > { %3167 = vst.msk [vmem:[%s5597_s11 + $0x5c] sm:$0xf] %vm3143_vm8, %v3594_v36  ;;  %v2977_v41 = vadd.f32 %v4089_v32, %v5589_v39  ;;  %v4091_v25 = vadd.f32 %v4058_v33, %v5662_v62  ;;  %v2885_v19 = vpop.f32.mrb[27].mxu0 }
 0x21a   : > { %3165 = vst.msk [vmem:[%s5597_s11 + $0x54] sm:$0xf] %vm3143_vm8, %v3592_v0  ;;  %v2975_v38 = vadd.f32 %v4090_v47, %v5589_v39  ;;  %v4092_v6 = vadd.f32 %v2885_v19, %v5664_v26 }
 0x21b   : > { %v3009_v4 = vmax.f32 %v2977_v41, 0.0  ;;  %v2978_v55 = vadd.f32 %v4091_v25, %v5589_v39 }
 0x21c   : > { %v3007_v48 = vmax.f32 %v2975_v38, 0.0  ;;  %v2976_v20 = vadd.f32 %v4092_v6, %v5589_v39 }
 0x21d   : > { %v3597_v54 = vpack.c.bf16 %v3009_v4, %v3009_v4  ;;  %v3010_v24 = vmax.f32 %v2978_v55, 0.0 }
 0x21e   : > { %v3595_v12 = vpack.c.bf16 %v3007_v48, %v3007_v48  ;;  %v3008_v62 = vmax.f32 %v2976_v20, 0.0  ;;  %v4061_v52 = vpop.f32.mrb[28].mxu0 }
 0x21f   : > { %3170 = vst.msk [vmem:[%s5597_s11 + $0x68] sm:$0xf] %vm3143_vm8, %v3597_v54  ;;  %v3598_v49 = vpack.c.bf16 %v3010_v24, %v3010_v24  ;;  %v4093_v3 = vadd.f32 %v4061_v52, %v3925_v21  ;;  %v2898_v14 = vpop.f32.mrb[29].mxu0 }
 0x220   : > { %3168 = vst.msk [vmem:[%s5597_s11 + $0x60] sm:$0xf] %vm3143_vm8, %v3595_v12  ;;  %v3596_v26 = vpack.c.bf16 %v3008_v62, %v3008_v62  ;;  %v4094_v56 = vadd.f32 %v2898_v14, %v1821_v37  ;;  %v4062_v50 = vpop.f32.mrb[30].mxu0 }
 0x221   : > { %3171 = vst.msk [vmem:[%s5597_s11 + $0x6c] sm:$0xf] %vm3143_vm8, %v3598_v49  ;;  %v2981_v40 = vadd.f32 %v4093_v3, %v5589_v39  ;;  %v4095_v22 = vadd.f32 %v4062_v50, %v5682_v59  ;;  %v2901_v35 = vpop.f32.mrb[31].mxu0 }
 0x222   : > { %3169 = vst.msk [vmem:[%s5597_s11 + $0x64] sm:$0xf] %vm3143_vm8, %v3596_v26  ;;  %v2979_v8 = vadd.f32 %v4094_v56, %v5589_v39  ;;  %v4096_v18 = vadd.f32 %v2901_v35, %v5684_v45 }
 0x223   : > { %v3013_v58 = vmax.f32 %v2981_v40, 0.0  ;;  %v2982_v21 = vadd.f32 %v4095_v22, %v5589_v39 }
 0x224   : > { %v3011_v10 = vmax.f32 %v2979_v8, 0.0  ;;  %v2980_v61 = vadd.f32 %v4096_v18, %v5589_v39 }
 0x225   : > { %v3601_v37 = vpack.c.bf16 %v3013_v58, %v3013_v58  ;;  %v3014_v11 = vmax.f32 %v2982_v21, 0.0 }
 0x226   : > { %v3599_v23 = vpack.c.bf16 %v3011_v10, %v3011_v10  ;;  %v3012_v59 = vmax.f32 %v2980_v61, 0.0 }
 0x227   : > { %3174 = vst.msk [vmem:[%s5597_s11 + $0x78] sm:$0xf] %vm3143_vm8, %v3601_v37  ;;  %v3602_v34 = vpack.c.bf16 %v3014_v11, %v3014_v11 }
 0x228   : > { %3172 = vst.msk [vmem:[%s5597_s11 + $0x70] sm:$0xf] %vm3143_vm8, %v3599_v23  ;;  %v3600_v39 = vpack.c.bf16 %v3012_v59, %v3012_v59 }
 0x229   : > { %3175 = vst.msk [vmem:[%s5597_s11 + $0x7c] sm:$0xf] %vm3143_vm8, %v3602_v34 }
 0x22a   : > { %3173 = vst.msk [vmem:[%s5597_s11 + $0x74] sm:$0xf] %vm3143_vm8, %v3600_v39 }
 0x22b   : > { %4422 = shalt.err (!%p4419_p5)
}
 0x22c   : > { %s4423_s4 = scalar_lea.hbm %s5739_s26, 2048  ;;  %s4427_s7 = scalar_lea.hbm %s5800_s3, 4096 }
 0x22d   : > { %p4424_p6 = scmp.ne.s32.totalorder %s5739_s26, %s4423_s4  ;;  %p4428_p10 = scmp.lt.u32.totalorder %s5739_s26, %s5800_s3 }
 0x22e   : > { %p4429_p11 = scmp.lt.u32.totalorder %s4427_s7, %s4423_s4  ;;  %p4431_p13 = scmp.lt.u32.totalorder %s4423_s4, %s5739_s26 }
 0x22f   : > { %p4425_p7 = pnand %p4424_p6, %p4552_p4 }
 0x230   : > { %p4430_p12 = por %p4429_p11, %p4428_p10 }
 0x231   : > { %p4426_p9 = pneg %p4425_p7 }
 0x232   : > { %p4432_p0 = por %p4431_p13, %p4430_p12 }
 0x234   : > { %p4433_p1 = pnand %p4432_p0, %p4426_p9 }
 0x236   : > { %4436 = shalt.err (!%p4433_p1)
}
 0x237   : > { %s4490_s10 = smov 64   ;;  %s4491_s11 = smov 4  }
 0x238   : > { %4332 = dma.vmem_to_hbm [thread:$0]  (%p4552_p4), %s5741_s19, 2048, %s5739_s26, %s5751_s15, %s4490_s10, %s4490_s10, %s4491_s11  }
 0x239 PF: > { %p4338_p2 = scmp.ge.s32.totalorder %s4487_s17, 2  ;;  %s3209_s18 = sand.u32 1, %s4467_s12  }
 0x23a   : > { %s3210_s21 = scalar_lea.sflag [#allocation3], %s3209_s18 }
 0x23b   : > { %p4335_p3 = pnand %p4338_p2, %p4559_p8 }
 0x23d   : > { %4462 = dma.done.wait (!%p4335_p3), %s3210_s21, 2048  }
 0x23e   : > { %4464 = vsyncadd (!%p4335_p3), %s3210_s21, 4294965248  ;;  %s16_s17 = sadd.s32 1, %s4487_s17   ;;  %s5974_s12 = smov %s4471_s13 }
 0x23f   : > { %p13_p5 = scmp.ge.s32.totalorder %s16_s17, 4   ;;  %s5975_s13 = smov %s4475_s14 }
 0x240   : > { %s5976_s14 = smov %s4565_s25  ;;  %s5977_s15 = smov %s4483_s16 }
 0x241   : > { %s5978_s16 = smov %s5980_s20  ;;  %15 = sbr.rel (!%p13_p5) target bundleno = 4 (0x4), region = 82 }
 0x248   :  { %3215 = vsyncpa [#allocation3], 1 }
 0x249   :  { %3217 = vsyncpa [#allocation3 + $0x1], 1 }

</bundles_post_ra>
